<compile_context>
chip_gen: v6e
topology: v6e:2x2x1
jax: 0.10.0
libtpu: 0.0.40
codegen_flags: <defaults>
</compile_context>

<pallas_src>
import functools
import math

import jax
import jax.numpy as jnp
from jax.experimental import pallas as pl
from jax.experimental.pallas import tpu as pltpu


def _round_up(x, m):
    return ((x + m - 1) // m) * m


def _cdiv(a, b):
    return (a + b - 1) // b


# ---------------------------------------------------------------------------
# Fused per-source kernel.
# refs layout: w1_0..w1_{D-1}, b1_0.., w2_0.., b2_0.., out_0..out_{D-1}
# ---------------------------------------------------------------------------
def _measurement_kernel(x_ref, *refs, modes, approx_recip):
    d = len(modes)
    w1_refs = refs[0:d]
    b1_refs = refs[d:2 * d]
    w2_refs = refs[2 * d:3 * d]
    b2_refs = refs[3 * d:4 * d]
    out_refs = refs[4 * d:5 * d]

    # In-kernel cast: x is streamed from HBM in float32 and cast to the MXU
    # compute dtype here (one fewer full HBM pass in the wrapper).
    x = x_ref[...].astype(w1_refs[0].dtype)

    for k in range(d):                                   # static unroll
        h = jnp.dot(x, w1_refs[k][...], preferred_element_type=jnp.float32)
        h = jnp.maximum(h + b1_refs[k][...], 0.0)        # bias + ReLU in f32
        y = jnp.dot(h.astype(w2_refs[k].dtype), w2_refs[k][...],
                    preferred_element_type=jnp.float32)
        y = y + b2_refs[k][...]

        mode = modes[k]
        if mode == "gauss":
            out = y
        elif mode == "softmax":                          # exact d_out lanes -> no masking
            m = jnp.max(y, axis=-1, keepdims=True)
            e = jnp.exp(y - m)
            denom = jnp.sum(e, axis=-1, keepdims=True)
            out = e * pl.reciprocal(denom, approx=approx_recip)
        else:                                            # softplus, numerically stable
            out = jnp.maximum(y, 0.0) + jnp.log(1.0 + jnp.exp(-jnp.abs(y)))

        out_refs[k][...] = out.astype(out_refs[k].dtype)


# ---------------------------------------------------------------------------
# Wrapper: grid / BlockSpecs / VMEM budgeting
# ---------------------------------------------------------------------------
_WEIGHT_SINGLE_BUFFER_OK = True     # flipped off if pl.Buffered(1) is rejected


def _vmem_capacity_bytes():
    try:
        return int(pltpu.get_tpu_info().vmem_capacity_bytes)
    except Exception:
        return 64 * 1024 * 1024     # conservative fallback (v7x per-core physical)


def _vmem_estimate(rb, d_in, hidden, d_outs, x_item, w_item):
    tiles = 2 * rb * d_in * x_item                          # double-buffered x tile
    tiles += 2 * sum(rb * do * 4 for do in d_outs)          # double-buffered f32 outputs
    weights = 2 * sum(d_in * hidden * w_item + hidden * 4 +
                      hidden * do * w_item + do * 4 for do in d_outs)
    live = rb * 4 * (2 * hidden + 2 * max(d_outs))          # h / y / activation temps
    return tiles + weights + live


def fused_measurement_pallas(x, w1s, b1s, w2s, b2s, *, modes, row_block=512,
                             approx_recip=False):
    """x: (N, d_in) float32.  Per-destination weights: w1 (d_in, H), b1 (1, H),
    w2 (H, d_out), b2 (1, d_out).  Returns one (N, d_out_k) float32 array per
    destination (exact shapes, no padding, no post-slicing)."""
    global _WEIGHT_SINGLE_BUFFER_OK

    n, d_in = x.shape
    d = len(modes)
    hidden = w1s[0].shape[1]
    d_outs = [w.shape[1] for w in w2s]
    x_item = jnp.dtype(x.dtype).itemsize
    w_item = jnp.dtype(w1s[0].dtype).itemsize

    # ---- generation-aware VMEM budget (counts resident weights + tiles) ----
    cap = _vmem_capacity_bytes()
    budget = int(cap * 0.85) - 4 * 1024 * 1024

    sub = 8
    rb = max(sub, _round_up(min(row_block, max(n, 1)), sub))
    # v7x megacore: keep >=2 row-grid steps when that still leaves big tiles.
    half = _round_up(_cdiv(n, 2), sub)
    if half >= 256:
        rb = min(rb, half)
    while rb > sub and _vmem_estimate(rb, d_in, hidden, d_outs, x_item, w_item) > budget:
        rb = max(sub, _round_up(rb // 2, sub))
    # TODO(synk): add a 128-aligned column-tiling grid axis for very large
    # data_dims so the footprint becomes independent of d_out (v7x, 64 MiB VMEM).

    need = _vmem_estimate(rb, d_in, hidden, d_outs, x_item, w_item)
    vmem_limit = int(min(int(cap * 0.85),
                         max(32 * 1024 * 1024, int(need * 1.5) + 4 * 1024 * 1024)))

    grid = (_cdiv(n, rb),)

    def build(single_buffer_weights):
        def w_spec(shape):
            if single_buffer_weights:
                return pl.BlockSpec(shape, lambda r: (0, 0),
                                    pipeline_mode=pl.Buffered(1))
            return pl.BlockSpec(shape, lambda r: (0, 0))

        in_specs = [pl.BlockSpec((rb, d_in), lambda r: (r, 0))]
        in_specs += [w_spec(w.shape) for w in w1s]
        in_specs += [w_spec(b.shape) for b in b1s]
        in_specs += [w_spec(w.shape) for w in w2s]
        in_specs += [w_spec(b.shape) for b in b2s]
        out_specs = [pl.BlockSpec((rb, do), lambda r: (r, 0)) for do in d_outs]
        out_shape = [jax.ShapeDtypeStruct((n, do), jnp.float32) for do in d_outs]

        return pl.pallas_call(
            functools.partial(_measurement_kernel, modes=tuple(modes),
                              approx_recip=approx_recip),
            out_shape=out_shape,
            grid_spec=pltpu.PrefetchScalarGridSpec(
                num_scalar_prefetch=0,
                grid=grid,
                in_specs=in_specs,
                out_specs=out_specs,
            ),
            compiler_params=pltpu.CompilerParams(
                dimension_semantics=("parallel",),
                vmem_limit_bytes=vmem_limit,
            ),
        )

    args = (x, *w1s, *b1s, *w2s, *b2s)
    if _WEIGHT_SINGLE_BUFFER_OK:
        try:
            return build(True)(*args)
        except Exception:
            _WEIGHT_SINGLE_BUFFER_OK = False   # fall back to default buffering
    return build(False)(*args)


# ---------------------------------------------------------------------------
# Measurement module (JAX port of the PyTorch nn.Module)
# ---------------------------------------------------------------------------
class Measurement:
    def __init__(self, zp_dims, hidden_dim, data_dims, recon_types, omics_names,
                 interpretable, key, compute_dtype=jnp.bfloat16, row_block=512):
        self.recon_types = recon_types
        self.omics_names = omics_names
        self.interpretable = interpretable
        self.compute_dtype = compute_dtype
        self.row_block = row_block
        self.hidden_dim = hidden_dim
        m = len(data_dims)

        # f32 master copies (nn.Linear-style uniform init), stored as (in, out)
        self.pair_params = {}
        for i in range(m):
            for j in range(m):
                if i == j:
                    continue
                name = "from_" + omics_names[i] + "_to_" + omics_names[j]
                key, k1, k2, k3, k4 = jax.random.split(key, 5)
                lim1 = 1.0 / math.sqrt(zp_dims[i])
                lim2 = 1.0 / math.sqrt(hidden_dim)
                self.pair_params[name] = dict(
                    w1=jax.random.uniform(k1, (zp_dims[i], hidden_dim),
                                          jnp.float32, -lim1, lim1),
                    b1=jax.random.uniform(k2, (1, hidden_dim),
                                          jnp.float32, -lim1, lim1),
                    w2=jax.random.uniform(k3, (hidden_dim, data_dims[j]),
                                          jnp.float32, -lim2, lim2),
                    b2=jax.random.uniform(k4, (1, data_dims[j]),
                                          jnp.float32, -lim2, lim2),
                )

        # fused per-source bundles (weights pre-cast to the MXU compute dtype,
        # biases kept in f32 — bias add and activations run in f32)
        self.fused = []
        for i in range(m):
            dests = [j for j in range(m) if j != i]
            if not dests:
                continue
            names, modes, w1s, b1s, w2s, b2s = [], [], [], [], [], []
            for j in dests:
                name = "from_" + omics_names[i] + "_to_" + omics_names[j]
                p = self.pair_params[name]
                names.append(name)
                if recon_types[j] == "gauss":
                    modes.append("gauss")
                elif interpretable:
                    modes.append("softmax")
                else:
                    modes.append("softplus")
                w1s.append(p["w1"].astype(compute_dtype))
                b1s.append(p["b1"])
                w2s.append(p["w2"].astype(compute_dtype))
                b2s.append(p["b2"])
            self.fused.append(dict(source=i, names=names, modes=tuple(modes),
                                   w1s=w1s, b1s=b1s, w2s=w2s, b2s=b2s))

    def __call__(self, zps):
        output = {}
        for f in self.fused:
            x = zps[f["source"]]        # f32 in HBM; cast happens inside the kernel
            outs = fused_measurement_pallas(
                x, f["w1s"], f["b1s"], f["w2s"], f["b2s"],
                modes=f["modes"], row_block=self.row_block)
            for name, y in zip(f["names"], outs):
                output[name] = y
        return output


# pure-JAX reference (f32, highest matmul precision) for correctness checking
def _reference(module, zps):
    out = {}
    m = len(module.omics_names)
    hp = jax.lax.Precision.HIGHEST
    for i in range(m):
        for j in range(m):
            if i == j:
                continue
            name = ("from_" + module.omics_names[i]
                    + "_to_" + module.omics_names[j])
            p = module.pair_params[name]
            h = jax.nn.relu(jnp.dot(zps[i], p["w1"], precision=hp) + p["b1"])
            y = jnp.dot(h, p["w2"], precision=hp) + p["b2"]
            if module.recon_types[j] == "gauss":
                out[name] = y
            elif module.interpretable:
                out[name] = jax.nn.softmax(y, axis=1)
            else:
                out[name] = jax.nn.softplus(y)
    return out


if __name__ == "__main__":
    key = jax.random.PRNGKey(0)

    # small synthetic config: 3 modalities, N not a multiple of 8, one d_out
    # above 128 so the softmax lane reduction spans multiple vregs.
    N = 40
    zp_dims = [16, 32, 24]
    hidden_dim = 32
    data_dims = [24, 40, 136]
    omics_names = ["rna", "prot", "atac"]
    recon_types = ["gauss", "nb", "nb"]      # gauss + non-gauss branches

    key, kz0, kz1, kz2, kp0, kp1, kp2 = jax.random.split(key, 7)
    zps = [
        jax.random.normal(kz0, (N, zp_dims[0]), jnp.float32),
        jax.random.normal(kz1, (N, zp_dims[1]), jnp.float32),
        jax.random.normal(kz2, (N, zp_dims[2]), jnp.float32),
    ]

    ok = True
    configs = [
        # (interpretable, key, compute_dtype, row_block, atol, rtol)
        (False, kp0, jnp.float32, 16, 1e-2, 1e-2),    # multi-step grid, partial tail tile, softplus
        (True,  kp1, jnp.float32, 512, 1e-2, 1e-2),   # softmax path, single grid step
        (True,  kp2, jnp.bfloat16, 64, 1e-1, 5e-2),   # bf16 MXU inputs (loose tolerance)
    ]
    for interpretable, kparam, cdt, rb, atol, rtol in configs:
        module = Measurement(zp_dims, hidden_dim, data_dims, recon_types,
                             omics_names, interpretable, kparam,
                             compute_dtype=cdt, row_block=rb)
        out = module(zps)
        for v in out.values():
            jax.block_until_ready(v)
        ref = _reference(module, zps)
        for name in ref:
            if out[name].shape != ref[name].shape:
                ok = False
            elif not jnp.allclose(out[name], ref[name], atol=atol, rtol=rtol):
                ok = False

    print("KERNEL_OK" if ok else "MISMATCH")
</pallas_src>

<mosaic_0001>
module attributes {stable_mosaic.version = 11 : i64} {
  func.func @_measurement_kernel(%arg0: i32, %arg1: memref<16x16xf32, #tpu.memory_space<vmem>>, %arg2: memref<16x32xf32, #tpu.memory_space<vmem>>, %arg3: memref<16x32xf32, #tpu.memory_space<vmem>>, %arg4: memref<1x32xf32, #tpu.memory_space<vmem>>, %arg5: memref<1x32xf32, #tpu.memory_space<vmem>>, %arg6: memref<32x40xf32, #tpu.memory_space<vmem>>, %arg7: memref<32x136xf32, #tpu.memory_space<vmem>>, %arg8: memref<1x40xf32, #tpu.memory_space<vmem>>, %arg9: memref<1x136xf32, #tpu.memory_space<vmem>>, %arg10: memref<16x40xf32, #tpu.memory_space<vmem>>, %arg11: memref<16x136xf32, #tpu.memory_space<vmem>>) attributes {dimension_semantics = [#tpu.dimension_semantics<parallel>], iteration_bounds = array<i64: 3>, scalar_prefetch = 0 : i64, scratch_operands = 0 : i64, tpu.core_type = #tpu.core_type<tc>, window_params = [{transform_indices = @transform_0, window_bounds = array<i64: 16, 16>}, {pipeline_mode = #tpu.pipeline_mode<synchronous>, transform_indices = @transform_1, window_bounds = array<i64: 16, 32>}, {pipeline_mode = #tpu.pipeline_mode<synchronous>, transform_indices = @transform_2, window_bounds = array<i64: 16, 32>}, {pipeline_mode = #tpu.pipeline_mode<synchronous>, transform_indices = @transform_3, window_bounds = array<i64: 1, 32>}, {pipeline_mode = #tpu.pipeline_mode<synchronous>, transform_indices = @transform_4, window_bounds = array<i64: 1, 32>}, {pipeline_mode = #tpu.pipeline_mode<synchronous>, transform_indices = @transform_5, window_bounds = array<i64: 32, 40>}, {pipeline_mode = #tpu.pipeline_mode<synchronous>, transform_indices = @transform_6, window_bounds = array<i64: 32, 136>}, {pipeline_mode = #tpu.pipeline_mode<synchronous>, transform_indices = @transform_7, window_bounds = array<i64: 1, 40>}, {pipeline_mode = #tpu.pipeline_mode<synchronous>, transform_indices = @transform_8, window_bounds = array<i64: 1, 136>}, {transform_indices = @transform_9, window_bounds = array<i64: 16, 40>}, {transform_indices = @transform_10, window_bounds = array<i64: 16, 136>}]} {
    %c0 = arith.constant 0 : index
    %c0_0 = arith.constant 0 : index
    %0 = vector.load %arg1[%c0, %c0_0] : memref<16x16xf32, #tpu.memory_space<vmem>>, vector<16x16xf32>
    %c0_1 = arith.constant 0 : index
    %c0_2 = arith.constant 0 : index
    %1 = vector.load %arg2[%c0_1, %c0_2] : memref<16x32xf32, #tpu.memory_space<vmem>>, vector<16x32xf32>
    %cst = arith.constant dense<0.000000e+00> : vector<16x32xf32>
    %2 = tpu.matmul %0, %1, %cst {dimension_numbers = #tpu.dot_dimension_numbers<[1], [0], [0], [1], [0, 0, 1, 1], [], []>} : vector<16x16xf32>, vector<16x32xf32>, vector<16x32xf32> -> vector<16x32xf32>
    %c0_3 = arith.constant 0 : index
    %c0_4 = arith.constant 0 : index
    %3 = vector.load %arg4[%c0_3, %c0_4] : memref<1x32xf32, #tpu.memory_space<vmem>>, vector<1x32xf32>
    %4 = vector.broadcast %3 : vector<1x32xf32> to vector<16x32xf32>
    %5 = arith.addf %2, %4 : vector<16x32xf32>
    %cst_5 = arith.constant 0.000000e+00 : f32
    %6 = vector.broadcast %cst_5 : f32 to vector<16x32xf32>
    %7 = arith.maximumf %5, %6 : vector<16x32xf32>
    %c0_6 = arith.constant 0 : index
    %c0_7 = arith.constant 0 : index
    %8 = vector.load %arg6[%c0_6, %c0_7] : memref<32x40xf32, #tpu.memory_space<vmem>>, vector<32x40xf32>
    %cst_8 = arith.constant dense<0.000000e+00> : vector<16x40xf32>
    %9 = tpu.matmul %7, %8, %cst_8 {dimension_numbers = #tpu.dot_dimension_numbers<[1], [0], [0], [1], [0, 0, 1, 1], [], []>} : vector<16x32xf32>, vector<32x40xf32>, vector<16x40xf32> -> vector<16x40xf32>
    %c0_9 = arith.constant 0 : index
    %c0_10 = arith.constant 0 : index
    %10 = vector.load %arg8[%c0_9, %c0_10] : memref<1x40xf32, #tpu.memory_space<vmem>>, vector<1x40xf32>
    %11 = vector.broadcast %10 : vector<1x40xf32> to vector<16x40xf32>
    %12 = arith.addf %9, %11 : vector<16x40xf32>
    %cst_11 = arith.constant 0.000000e+00 : f32
    %13 = vector.broadcast %cst_11 : f32 to vector<16x40xf32>
    %14 = arith.maximumf %12, %13 : vector<16x40xf32>
    %15 = math.absf %12 : vector<16x40xf32>
    %cst_12 = arith.constant 0.000000e+00 : f32
    %16 = vector.broadcast %cst_12 : f32 to vector<16x40xf32>
    %17 = arith.subf %16, %15 : vector<16x40xf32>
    %18 = math.exp %17 : vector<16x40xf32>
    %cst_13 = arith.constant 1.000000e+00 : f32
    %19 = vector.broadcast %cst_13 : f32 to vector<16x40xf32>
    %20 = arith.addf %19, %18 : vector<16x40xf32>
    %21 = math.log %20 : vector<16x40xf32>
    %22 = arith.addf %14, %21 : vector<16x40xf32>
    %c0_14 = arith.constant 0 : index
    %c0_15 = arith.constant 0 : index
    %23 = vector.load %arg10[%c0_14, %c0_15] : memref<16x40xf32, #tpu.memory_space<vmem>>, vector<16x40xf32>
    tpu.vector_store %arg10[%c0_14, %c0_15], %22 {strides = array<i32>} : memref<16x40xf32, #tpu.memory_space<vmem>>, vector<16x40xf32>,
    %c0_16 = arith.constant 0 : index
    %c0_17 = arith.constant 0 : index
    %24 = vector.load %arg3[%c0_16, %c0_17] : memref<16x32xf32, #tpu.memory_space<vmem>>, vector<16x32xf32>
    %cst_18 = arith.constant dense<0.000000e+00> : vector<16x32xf32>
    %25 = tpu.matmul %0, %24, %cst_18 {dimension_numbers = #tpu.dot_dimension_numbers<[1], [0], [0], [1], [0, 0, 1, 1], [], []>} : vector<16x16xf32>, vector<16x32xf32>, vector<16x32xf32> -> vector<16x32xf32>
    %c0_19 = arith.constant 0 : index
    %c0_20 = arith.constant 0 : index
    %26 = vector.load %arg5[%c0_19, %c0_20] : memref<1x32xf32, #tpu.memory_space<vmem>>, vector<1x32xf32>
    %27 = vector.broadcast %26 : vector<1x32xf32> to vector<16x32xf32>
    %28 = arith.addf %25, %27 : vector<16x32xf32>
    %cst_21 = arith.constant 0.000000e+00 : f32
    %29 = vector.broadcast %cst_21 : f32 to vector<16x32xf32>
    %30 = arith.maximumf %28, %29 : vector<16x32xf32>
    %c0_22 = arith.constant 0 : index
    %c0_23 = arith.constant 0 : index
    %31 = vector.load %arg7[%c0_22, %c0_23] : memref<32x136xf32, #tpu.memory_space<vmem>>, vector<32x136xf32>
    %cst_24 = arith.constant dense<0.000000e+00> : vector<16x136xf32>
    %32 = tpu.matmul %30, %31, %cst_24 {dimension_numbers = #tpu.dot_dimension_numbers<[1], [0], [0], [1], [0, 0, 1, 1], [], []>} : vector<16x32xf32>, vector<32x136xf32>, vector<16x136xf32> -> vector<16x136xf32>
    %c0_25 = arith.constant 0 : index
    %c0_26 = arith.constant 0 : index
    %33 = vector.load %arg9[%c0_25, %c0_26] : memref<1x136xf32, #tpu.memory_space<vmem>>, vector<1x136xf32>
    %34 = vector.broadcast %33 : vector<1x136xf32> to vector<16x136xf32>
    %35 = arith.addf %32, %34 : vector<16x136xf32>
    %cst_27 = arith.constant 0.000000e+00 : f32
    %36 = vector.broadcast %cst_27 : f32 to vector<16x136xf32>
    %37 = arith.maximumf %35, %36 : vector<16x136xf32>
    %38 = math.absf %35 : vector<16x136xf32>
    %cst_28 = arith.constant 0.000000e+00 : f32
    %39 = vector.broadcast %cst_28 : f32 to vector<16x136xf32>
    %40 = arith.subf %39, %38 : vector<16x136xf32>
    %41 = math.exp %40 : vector<16x136xf32>
    %cst_29 = arith.constant 1.000000e+00 : f32
    %42 = vector.broadcast %cst_29 : f32 to vector<16x136xf32>
    %43 = arith.addf %42, %41 : vector<16x136xf32>
    %44 = math.log %43 : vector<16x136xf32>
    %45 = arith.addf %37, %44 : vector<16x136xf32>
    %c0_30 = arith.constant 0 : index
    %c0_31 = arith.constant 0 : index
    %46 = vector.load %arg11[%c0_30, %c0_31] : memref<16x136xf32, #tpu.memory_space<vmem>>, vector<16x136xf32>
    tpu.vector_store %arg11[%c0_30, %c0_31], %45 {strides = array<i32>} : memref<16x136xf32, #tpu.memory_space<vmem>>, vector<16x136xf32>,
    return
  }
  func.func @transform_0(%arg0: i32) -> (i32, i32) {
    %c0_i32 = arith.constant 0 : i32
    %c0_i32_0 = arith.constant 0 : i32
    return %arg0, %c0_i32 : i32, i32
  }
  func.func @transform_1(%arg0: i32) -> (i32, i32) {
    %c0_i32 = arith.constant 0 : i32
    %c0_i32_0 = arith.constant 0 : i32
    %c0_i32_1 = arith.constant 0 : i32
    return %c0_i32, %c0_i32_0 : i32, i32
  }
  func.func @transform_2(%arg0: i32) -> (i32, i32) {
    %c0_i32 = arith.constant 0 : i32
    %c0_i32_0 = arith.constant 0 : i32
    %c0_i32_1 = arith.constant 0 : i32
    return %c0_i32, %c0_i32_0 : i32, i32
  }
  func.func @transform_3(%arg0: i32) -> (i32, i32) {
    %c0_i32 = arith.constant 0 : i32
    %c0_i32_0 = arith.constant 0 : i32
    %c0_i32_1 = arith.constant 0 : i32
    return %c0_i32, %c0_i32_0 : i32, i32
  }
  func.func @transform_4(%arg0: i32) -> (i32, i32) {
    %c0_i32 = arith.constant 0 : i32
    %c0_i32_0 = arith.constant 0 : i32
    %c0_i32_1 = arith.constant 0 : i32
    return %c0_i32, %c0_i32_0 : i32, i32
  }
  func.func @transform_5(%arg0: i32) -> (i32, i32) {
    %c0_i32 = arith.constant 0 : i32
    %c0_i32_0 = arith.constant 0 : i32
    %c0_i32_1 = arith.constant 0 : i32
    return %c0_i32, %c0_i32_0 : i32, i32
  }
  func.func @transform_6(%arg0: i32) -> (i32, i32) {
    %c0_i32 = arith.constant 0 : i32
    %c0_i32_0 = arith.constant 0 : i32
    %c0_i32_1 = arith.constant 0 : i32
    return %c0_i32, %c0_i32_0 : i32, i32
  }
  func.func @transform_7(%arg0: i32) -> (i32, i32) {
    %c0_i32 = arith.constant 0 : i32
    %c0_i32_0 = arith.constant 0 : i32
    %c0_i32_1 = arith.constant 0 : i32
    return %c0_i32, %c0_i32_0 : i32, i32
  }
  func.func @transform_8(%arg0: i32) -> (i32, i32) {
    %c0_i32 = arith.constant 0 : i32
    %c0_i32_0 = arith.constant 0 : i32
    %c0_i32_1 = arith.constant 0 : i32
    return %c0_i32, %c0_i32_0 : i32, i32
  }
  func.func @transform_9(%arg0: i32) -> (i32, i32) {
    %c0_i32 = arith.constant 0 : i32
    %c0_i32_0 = arith.constant 0 : i32
    return %arg0, %c0_i32 : i32, i32
  }
  func.func @transform_10(%arg0: i32) -> (i32, i32) {
    %c0_i32 = arith.constant 0 : i32
    %c0_i32_0 = arith.constant 0 : i32
    return %arg0, %c0_i32 : i32, i32
  }
}

module attributes {stable_mosaic.version = 11 : i64} {
  func.func @_measurement_kernel(%arg0: i32, %arg1: memref<16x16xf32, #tpu.memory_space<vmem>>, %arg2: memref<16x32xf32, #tpu.memory_space<vmem>>, %arg3: memref<16x32xf32, #tpu.memory_space<vmem>>, %arg4: memref<1x32xf32, #tpu.memory_space<vmem>>, %arg5: memref<1x32xf32, #tpu.memory_space<vmem>>, %arg6: memref<32x40xf32, #tpu.memory_space<vmem>>, %arg7: memref<32x136xf32, #tpu.memory_space<vmem>>, %arg8: memref<1x40xf32, #tpu.memory_space<vmem>>, %arg9: memref<1x136xf32, #tpu.memory_space<vmem>>, %arg10: memref<16x40xf32, #tpu.memory_space<vmem>>, %arg11: memref<16x136xf32, #tpu.memory_space<vmem>>) attributes {dimension_semantics = [#tpu.dimension_semantics<parallel>], iteration_bounds = array<i64: 3>, scalar_prefetch = 0 : i64, scratch_operands = 0 : i64, tpu.core_type = #tpu.core_type<tc>, window_params = [{transform_indices = @transform_0, window_bounds = array<i64: 16, 16>}, {pipeline_mode = #tpu.pipeline_mode<synchronous>, transform_indices = @transform_1, window_bounds = array<i64: 16, 32>}, {pipeline_mode = #tpu.pipeline_mode<synchronous>, transform_indices = @transform_2, window_bounds = array<i64: 16, 32>}, {pipeline_mode = #tpu.pipeline_mode<synchronous>, transform_indices = @transform_3, window_bounds = array<i64: 1, 32>}, {pipeline_mode = #tpu.pipeline_mode<synchronous>, transform_indices = @transform_4, window_bounds = array<i64: 1, 32>}, {pipeline_mode = #tpu.pipeline_mode<synchronous>, transform_indices = @transform_5, window_bounds = array<i64: 32, 40>}, {pipeline_mode = #tpu.pipeline_mode<synchronous>, transform_indices = @transform_6, window_bounds = array<i64: 32, 136>}, {pipeline_mode = #tpu.pipeline_mode<synchronous>, transform_indices = @transform_7, window_bounds = array<i64: 1, 40>}, {pipeline_mode = #tpu.pipeline_mode<synchronous>, transform_indices = @transform_8, window_bounds = array<i64: 1, 136>}, {transform_indices = @transform_9, window_bounds = array<i64: 16, 40>}, {transform_indices = @transform_10, window_bounds = array<i64: 16, 136>}]} {
    %c0 = arith.constant 0 : index
    %c0_0 = arith.constant 0 : index
    %0 = vector.load %arg1[%c0, %c0_0] : memref<16x16xf32, #tpu.memory_space<vmem>>, vector<16x16xf32>
    %c0_1 = arith.constant 0 : index
    %c0_2 = arith.constant 0 : index
    %1 = vector.load %arg2[%c0_1, %c0_2] : memref<16x32xf32, #tpu.memory_space<vmem>>, vector<16x32xf32>
    %cst = arith.constant dense<0.000000e+00> : vector<16x32xf32>
    %2 = tpu.matmul %0, %1, %cst {dimension_numbers = #tpu.dot_dimension_numbers<[1], [0], [0], [1], [0, 0, 1, 1], [], []>} : vector<16x16xf32>, vector<16x32xf32>, vector<16x32xf32> -> vector<16x32xf32>
    %c0_3 = arith.constant 0 : index
    %c0_4 = arith.constant 0 : index
    %3 = vector.load %arg4[%c0_3, %c0_4] : memref<1x32xf32, #tpu.memory_space<vmem>>, vector<1x32xf32>
    %4 = vector.broadcast %3 : vector<1x32xf32> to vector<16x32xf32>
    %5 = arith.addf %2, %4 : vector<16x32xf32>
    %cst_5 = arith.constant 0.000000e+00 : f32
    %6 = vector.broadcast %cst_5 : f32 to vector<16x32xf32>
    %7 = arith.maximumf %5, %6 : vector<16x32xf32>
    %c0_6 = arith.constant 0 : index
    %c0_7 = arith.constant 0 : index
    %8 = vector.load %arg6[%c0_6, %c0_7] : memref<32x40xf32, #tpu.memory_space<vmem>>, vector<32x40xf32>
    %cst_8 = arith.constant dense<0.000000e+00> : vector<16x40xf32>
    %9 = tpu.matmul %7, %8, %cst_8 {dimension_numbers = #tpu.dot_dimension_numbers<[1], [0], [0], [1], [0, 0, 1, 1], [], []>} : vector<16x32xf32>, vector<32x40xf32>, vector<16x40xf32> -> vector<16x40xf32>
    %c0_9 = arith.constant 0 : index
    %c0_10 = arith.constant 0 : index
    %10 = vector.load %arg8[%c0_9, %c0_10] : memref<1x40xf32, #tpu.memory_space<vmem>>, vector<1x40xf32>
    %11 = vector.broadcast %10 : vector<1x40xf32> to vector<16x40xf32>
    %12 = arith.addf %9, %11 : vector<16x40xf32>
    %cst_11 = arith.constant 0.000000e+00 : f32
    %13 = vector.broadcast %cst_11 : f32 to vector<16x40xf32>
    %14 = arith.maximumf %12, %13 : vector<16x40xf32>
    %15 = math.absf %12 : vector<16x40xf32>
    %cst_12 = arith.constant 0.000000e+00 : f32
    %16 = vector.broadcast %cst_12 : f32 to vector<16x40xf32>
    %17 = arith.subf %16, %15 : vector<16x40xf32>
    %18 = math.exp %17 : vector<16x40xf32>
    %cst_13 = arith.constant 1.000000e+00 : f32
    %19 = vector.broadcast %cst_13 : f32 to vector<16x40xf32>
    %20 = arith.addf %19, %18 : vector<16x40xf32>
    %21 = math.log %20 : vector<16x40xf32>
    %22 = arith.addf %14, %21 : vector<16x40xf32>
    %c0_14 = arith.constant 0 : index
    %c0_15 = arith.constant 0 : index
    %23 = vector.load %arg10[%c0_14, %c0_15] : memref<16x40xf32, #tpu.memory_space<vmem>>, vector<16x40xf32>
    tpu.vector_store %arg10[%c0_14, %c0_15], %22 {strides = array<i32>} : memref<16x40xf32, #tpu.memory_space<vmem>>, vector<16x40xf32>,
    %c0_16 = arith.constant 0 : index
    %c0_17 = arith.constant 0 : index
    %24 = vector.load %arg3[%c0_16, %c0_17] : memref<16x32xf32, #tpu.memory_space<vmem>>, vector<16x32xf32>
    %cst_18 = arith.constant dense<0.000000e+00> : vector<16x32xf32>
    %25 = tpu.matmul %0, %24, %cst_18 {dimension_numbers = #tpu.dot_dimension_numbers<[1], [0], [0], [1], [0, 0, 1, 1], [], []>} : vector<16x16xf32>, vector<16x32xf32>, vector<16x32xf32> -> vector<16x32xf32>
    %c0_19 = arith.constant 0 : index
    %c0_20 = arith.constant 0 : index
    %26 = vector.load %arg5[%c0_19, %c0_20] : memref<1x32xf32, #tpu.memory_space<vmem>>, vector<1x32xf32>
    %27 = vector.broadcast %26 : vector<1x32xf32> to vector<16x32xf32>
    %28 = arith.addf %25, %27 : vector<16x32xf32>
    %cst_21 = arith.constant 0.000000e+00 : f32
    %29 = vector.broadcast %cst_21 : f32 to vector<16x32xf32>
    %30 = arith.maximumf %28, %29 : vector<16x32xf32>
    %c0_22 = arith.constant 0 : index
    %c0_23 = arith.constant 0 : index
    %31 = vector.load %arg7[%c0_22, %c0_23] : memref<32x136xf32, #tpu.memory_space<vmem>>, vector<32x136xf32>
    %cst_24 = arith.constant dense<0.000000e+00> : vector<16x136xf32>
    %32 = tpu.matmul %30, %31, %cst_24 {dimension_numbers = #tpu.dot_dimension_numbers<[1], [0], [0], [1], [0, 0, 1, 1], [], []>} : vector<16x32xf32>, vector<32x136xf32>, vector<16x136xf32> -> vector<16x136xf32>
    %c0_25 = arith.constant 0 : index
    %c0_26 = arith.constant 0 : index
    %33 = vector.load %arg9[%c0_25, %c0_26] : memref<1x136xf32, #tpu.memory_space<vmem>>, vector<1x136xf32>
    %34 = vector.broadcast %33 : vector<1x136xf32> to vector<16x136xf32>
    %35 = arith.addf %32, %34 : vector<16x136xf32>
    %cst_27 = arith.constant 0.000000e+00 : f32
    %36 = vector.broadcast %cst_27 : f32 to vector<16x136xf32>
    %37 = arith.maximumf %35, %36 : vector<16x136xf32>
    %38 = math.absf %35 : vector<16x136xf32>
    %cst_28 = arith.constant 0.000000e+00 : f32
    %39 = vector.broadcast %cst_28 : f32 to vector<16x136xf32>
    %40 = arith.subf %39, %38 : vector<16x136xf32>
    %41 = math.exp %40 : vector<16x136xf32>
    %cst_29 = arith.constant 1.000000e+00 : f32
    %42 = vector.broadcast %cst_29 : f32 to vector<16x136xf32>
    %43 = arith.addf %42, %41 : vector<16x136xf32>
    %44 = math.log %43 : vector<16x136xf32>
    %45 = arith.addf %37, %44 : vector<16x136xf32>
    %c0_30 = arith.constant 0 : index
    %c0_31 = arith.constant 0 : index
    %46 = vector.load %arg11[%c0_30, %c0_31] : memref<16x136xf32, #tpu.memory_space<vmem>>, vector<16x136xf32>
    tpu.vector_store %arg11[%c0_30, %c0_31], %45 {strides = array<i32>} : memref<16x136xf32, #tpu.memory_space<vmem>>, vector<16x136xf32>,
    return
  }
  func.func @transform_0(%arg0: i32) -> (i32, i32) {
    %c0_i32 = arith.constant 0 : i32
    %c0_i32_0 = arith.constant 0 : i32
    return %arg0, %c0_i32 : i32, i32
  }
  func.func @transform_1(%arg0: i32) -> (i32, i32) {
    %c0_i32 = arith.constant 0 : i32
    %c0_i32_0 = arith.constant 0 : i32
    %c0_i32_1 = arith.constant 0 : i32
    return %c0_i32, %c0_i32_0 : i32, i32
  }
  func.func @transform_2(%arg0: i32) -> (i32, i32) {
    %c0_i32 = arith.constant 0 : i32
    %c0_i32_0 = arith.constant 0 : i32
    %c0_i32_1 = arith.constant 0 : i32
    return %c0_i32, %c0_i32_0 : i32, i32
  }
  func.func @transform_3(%arg0: i32) -> (i32, i32) {
    %c0_i32 = arith.constant 0 : i32
    %c0_i32_0 = arith.constant 0 : i32
    %c0_i32_1 = arith.constant 0 : i32
    return %c0_i32, %c0_i32_0 : i32, i32
  }
  func.func @transform_4(%arg0: i32) -> (i32, i32) {
    %c0_i32 = arith.constant 0 : i32
    %c0_i32_0 = arith.constant 0 : i32
    %c0_i32_1 = arith.constant 0 : i32
    return %c0_i32, %c0_i32_0 : i32, i32
  }
  func.func @transform_5(%arg0: i32) -> (i32, i32) {
    %c0_i32 = arith.constant 0 : i32
    %c0_i32_0 = arith.constant 0 : i32
    %c0_i32_1 = arith.constant 0 : i32
    return %c0_i32, %c0_i32_0 : i32, i32
  }
  func.func @transform_6(%arg0: i32) -> (i32, i32) {
    %c0_i32 = arith.constant 0 : i32
    %c0_i32_0 = arith.constant 0 : i32
    %c0_i32_1 = arith.constant 0 : i32
    return %c0_i32, %c0_i32_0 : i32, i32
  }
  func.func @transform_7(%arg0: i32) -> (i32, i32) {
    %c0_i32 = arith.constant 0 : i32
    %c0_i32_0 = arith.constant 0 : i32
    %c0_i32_1 = arith.constant 0 : i32
    return %c0_i32, %c0_i32_0 : i32, i32
  }
  func.func @transform_8(%arg0: i32) -> (i32, i32) {
    %c0_i32 = arith.constant 0 : i32
    %c0_i32_0 = arith.constant 0 : i32
    %c0_i32_1 = arith.constant 0 : i32
    return %c0_i32, %c0_i32_0 : i32, i32
  }
  func.func @transform_9(%arg0: i32) -> (i32, i32) {
    %c0_i32 = arith.constant 0 : i32
    %c0_i32_0 = arith.constant 0 : i32
    return %arg0, %c0_i32 : i32, i32
  }
  func.func @transform_10(%arg0: i32) -> (i32, i32) {
    %c0_i32 = arith.constant 0 : i32
    %c0_i32_0 = arith.constant 0 : i32
    return %arg0, %c0_i32 : i32, i32
  }
}

</mosaic_0001>

<bundles_post_ra>
// kernel: tpu_custom_call.1
= control target key start
LH: loop header
LB: loop body
LE: loop exit
PB: predicated region body
PF: predicated region fallthrough
CT: control target
= control target key end

     0   :  { %s1926_s0 = inlined_call_operand.vmem [shape: f32[40,16], index: 0, kind: input, shape index: {}]   ;;  %s1927_s1 = inlined_call_operand.hbm [shape: f32[16,32], index: 1, kind: input, shape index: {}]   ;;  %s1928_s2 = inlined_call_operand.hbm [shape: f32[16,32], index: 2, kind: input, shape index: {}]   ;;  %s1929_s3 = inlined_call_operand.hbm [shape: f32[1,32], index: 3, kind: input, shape index: {}]   ;;  %s1930_s4 = inlined_call_operand.hbm [shape: f32[1,32], index: 4, kind: input, shape index: {}]   ;;  %s1931_s5 = inlined_call_operand.hbm [shape: f32[32,40], index: 5, kind: input, shape index: {}]   ;;  %s1932_s6 = inlined_call_operand.vmem [shape: f32[32,136], index: 6, kind: input, shape index: {}]   ;;  %s1933_s7 = inlined_call_operand.vmem [shape: f32[1,40], index: 7, kind: input, shape index: {}]   ;;  %s1934_s8 = inlined_call_operand.vmem [shape: f32[1,136], index: 8, kind: input, shape index: {}]   ;;  %s1935_s9 = inlined_call_operand.hbm [shape: f32[40,40], index: 9, kind: output, shape index: {0}]   ;;  %s1936_s10 = inlined_call_operand.hbm [shape: f32[40,136], index: 10, kind: output, shape index: {1}]  }
   0x1   :  { %1943 = sst [smem:[#allocation22_spill]] %s1926_s0 }
   0x2   :  { %16 = vsyncpa [#allocation3], 0 }
   0x3   :  { %17 = vsyncpa [#allocation6], 0 }
   0x4   :  { %18 = vsyncpa [#allocation9], 0 }
   0x5   :  { %19 = vsyncpa [#allocation4], 0 }
   0x6   :  { %21 = vsyncpa [#allocation4 + $0x1], 0 }
   0x7   :  { %22 = vsyncpa [#allocation13], 0 }
   0x8   :  { %24 = vsyncpa [#allocation13 + $0x1], 0  ;;  %s1620_s13 = smov 0   ;;  %s1622_s14 = smov 0  }
   0x9   :  { %s1624_s15 = smov 0   ;;  %s1626_s16 = smov 0  }
   0xa LB: > { %1944 = sst [smem:[#allocation19_spill]] %s1545_s15  ;;  %s1641_s17 = sadd.s32 4294967295, %s1549_s16   ;;  %s1549_s16 = sphi %s1626_s16, %s1966_s16   ;;  %s1545_s15 = sphi %s1624_s15, %s1968_s15   ;;  %s1541_s14 = sphi %s1622_s14, %s1970_s14   ;;  %s1537_s13 = sphi %s1620_s13, %s1969_s13  }
   0xb   : > { %s1103_s18 = sadd.s32 4294967294, %s1549_s16   ;;  %s1645_s19 = sadd.s32 1, %s1549_s16  }
   0xc   : > { %1945 = sst [smem:[#allocation20_spill]] %s1645_s19  ;;  %s231_s20 = sadd.s32 1, %s1545_s15 }
   0xd   : > { %s228_s21 = ssub.s32 %s1549_s16, %s1645_s19  ;;  %p241_p0 = scmp.ne.s32.totalorder %s1545_s15, %s1541_s14 }
   0xe   : > { %p229_p1 = scmp.eq.s32.totalorder %s228_s21, 0  ;;  %p242_p2 = scmp.eq.s32.totalorder %s1641_s17, 2 }
   0xf   : > { %p247_p3 = scmp.ne.s32.totalorder %s1541_s14, %s1537_s13  ;;  %p248_p4 = scmp.eq.s32.totalorder %s1103_s18, 2 }
  0x10   : > { %s1656_s22 = scalar_select %p229_p1, %s1545_s15, %s231_s20  }
  0x11   : > { %p1658_p5 = por %p242_p2, %p241_p0  ;;  %p1662_p6 = por %p248_p4, %p247_p3 }
  0x12   : > { %1946 = sst [smem:[#allocation21_spill]] %s1656_s22  ;;  %p1104_p7 = scmp.ge.s32.totalorder %s1549_s16, 1 }
  0x13   : > { %s1947_s23 = scalar_select %p1658_p5, 1, 0 }
  0x14   : > { %s1948_s24 = scalar_select %p1662_p6, 1, 0 }
  0x15   : > { %p281_p8 = scmp.lt.s32.totalorder %s1549_s16, 4  ;;  %p1940_p9 = scmp.eq.s32.totalorder %s1641_s17, 0 }
  0x16   : > { %s1551_s26 = smov [#allocation5]   ;;  %s1552_s29 = smov [#allocation8]  }
  0x17   : > { %p1669_p10 = pnand %p1104_p7, %p281_p8  ;;  %s306_s27 = sshll.u32 %s1551_s26, 4  ;;  %s307_s27 = int_to_ptr.vmem [resolvable:$true] %s306_s27 }
  0x18   : > { %s331_s30 = sshll.u32 %s1552_s29, 4  ;;  %s1553_s11 = smov [#allocation2]   ;;  %s332_s30 = int_to_ptr.vmem [resolvable:$true] %s331_s30 }
  0x19   : > { %s1949_s25 = scalar_select %p1669_p10, 1, 0 }
  0x1a   : > { %p1215_p11 = pneg %p1669_p10  ;;  %s293_s12 = sshll.u32 %s1553_s11, 4  ;;  %s294_s12 = int_to_ptr.vmem [resolvable:$true] %s293_s12 }
  0x1b   : > { %s1328_s20 = scalar_lea.vmem %s307_s27, 256  ;;  %p1336_p3 = scmp.lt.s32.totalorder %s307_s27, %s307_s27 }
  0x1c   : > { %p1677_p12 = pnand %p1940_p9, %p1215_p11  ;;  %p1329_p0 = scmp.ne.s32.totalorder %s307_s27, %s1328_s20 }
  0x1d   : > { %p1337_p4 = scmp.lt.s32.totalorder %s1328_s20, %s1328_s20 }
  0x1e   : > { %p1683_p13 = pneg %p1677_p12 }
  0x1f   : > { %p1338_p7 = por %p1337_p4, %p1336_p3 }
  0x20   : > { %p1331_p1 = pnand %p1329_p0, %p1683_p13 }
  0x22   : > { %p1332_p2 = pneg %p1331_p1 }
  0x24   : > { %p1339_p8 = pnand %p1338_p7, %p1332_p2 }
  0x26   : > { %1342 = shalt.err (!%p1339_p8)
}
  0x27   : > { %s1554_s21 = smov 128   ;;  %s1555_s26 = smov 8  }
  0x28   : > { %1221 = dma.hbm_to_vmem [thread:$0]  (!%p1677_p12), %s1928_s2, 256, %s307_s27, [#allocation6], %s1554_s21, %s1554_s21, %s1555_s26  }
  0x29   : > { %s1354_s22 = scalar_lea.vmem %s332_s30, 16  ;;  %s1361_s20 = scalar_lea.vmem %s332_s30, 32 }
  0x2a   : > { %p1355_p11 = scmp.ne.s32.totalorder %s332_s30, %s1354_s22  ;;  %p1362_p2 = scmp.lt.s32.totalorder %s332_s30, %s332_s30 }
  0x2b   : > { %p1363_p3 = scmp.lt.s32.totalorder %s1361_s20, %s1354_s22 }
  0x2c   : > { %p1357_p0 = pnand %p1355_p11, %p1683_p13 }
  0x2d   : > { %p1364_p4 = por %p1363_p3, %p1362_p2 }
  0x2e   : > { %p1358_p1 = pneg %p1357_p0 }
  0x30   : > { %p1365_p7 = pnand %p1364_p4, %p1358_p1 }
  0x32   : > { %1368 = shalt.err (!%p1365_p7)
}
  0x33   : > { %1227 = dma.hbm_to_vmem [thread:$0]  (!%p1677_p12), %s1930_s4, 16, %s332_s30, [#allocation9]  }
  0x34   : > { %s1380_s27 = scalar_lea.vmem %s294_s12, 256  ;;  %p1388_p0 = scmp.lt.s32.totalorder %s294_s12, %s294_s12 }
  0x35   : > { %p1381_p8 = scmp.ne.s32.totalorder %s294_s12, %s1380_s27  ;;  %p1389_p6 = scmp.lt.s32.totalorder %s1380_s27, %s1380_s27 }
  0x37   : > { %p1383_p9 = pnand %p1381_p8, %p1683_p13  ;;  %p1390_p5 = por %p1389_p6, %p1388_p0 }
  0x39   : > { %p1384_p11 = pneg %p1383_p9 }
  0x3b   : > { %p1391_p10 = pnand %p1390_p5, %p1384_p11 }
  0x3d   : > { %1394 = shalt.err (!%p1391_p10)
}
  0x3e   : > { %1218 = dma.hbm_to_vmem [thread:$0]  (!%p1677_p12), %s1927_s1, 256, %s294_s12, [#allocation3], %s1554_s21, %s1554_s21, %s1555_s26  }
  0x3f   : > { %s1556_s19 = smov [#allocation7]   ;;  %s1557_s29 = smov [#allocation10]  }
  0x40   : > { %s320_s30 = sshll.u32 %s1556_s19, 4  ;;  %s341_s11 = sshll.u32 %s1557_s29, 4  ;;  %s321_s30 = int_to_ptr.vmem [resolvable:$true] %s320_s30  ;;  %s342_s11 = int_to_ptr.vmem [resolvable:$true] %s341_s11 }
  0x41   : > { %s1406_s20 = scalar_lea.vmem %s321_s30, 16  ;;  %s1413_s27 = scalar_lea.vmem %s321_s30, 32 }
  0x42   : > { %p1407_p9 = scmp.ne.s32.totalorder %s321_s30, %s1406_s20  ;;  %p1414_p10 = scmp.lt.s32.totalorder %s321_s30, %s321_s30 }
  0x43   : > { %p1415_p1 = scmp.lt.s32.totalorder %s1413_s27, %s1406_s20 }
  0x44   : > { %p1409_p5 = pnand %p1407_p9, %p1683_p13 }
  0x45   : > { %p1416_p2 = por %p1415_p1, %p1414_p10 }
  0x46   : > { %p1410_p6 = pneg %p1409_p5 }
  0x48   : > { %p1417_p3 = pnand %p1416_p2, %p1410_p6 }
  0x4a   : > { %1420 = shalt.err (!%p1417_p3)
}
  0x4b   : > { %1224 = dma.hbm_to_vmem [thread:$0]  (!%p1677_p12), %s1929_s3, 16, %s321_s30, [#allocation6]  }
  0x4c   : > { %s1432_s15 = scalar_lea.vmem %s342_s11, 512  ;;  %p1440_p11 = scmp.lt.s32.totalorder %s342_s11, %s342_s11 }
  0x4d   : > { %p1433_p4 = scmp.ne.s32.totalorder %s342_s11, %s1432_s15  ;;  %p1441_p0 = scmp.lt.s32.totalorder %s1432_s15, %s1432_s15 }
  0x4f   : > { %p1435_p7 = pnand %p1433_p4, %p1683_p13  ;;  %p1442_p9 = por %p1441_p0, %p1440_p11 }
  0x51   : > { %p1436_p8 = pneg %p1435_p7 }
  0x53   : > { %p1443_p5 = pnand %p1442_p9, %p1436_p8 }
  0x55   : > { %1446 = shalt.err (!%p1443_p5)
}
  0x56   : > { %1230 = dma.hbm_to_vmem [thread:$0]  (!%p1677_p12), %s1931_s5, 512, %s342_s11, [#allocation9], %s1554_s21, %s1554_s21, %s1555_s26  }
  0x57   : > { %p1952_p6 = scmp.ne.s32.totalorder %s1949_s25, 0 }
  0x58   : > { %p1953_p13 = scmp.eq.s32.totalorder (!%p1952_p6), %s1641_s17, 0 }
  0x59   : > { %383 = sbr.rel (%p1952_p6) target bundleno = 615 (0x267), region = 56 }
  0x5e   : > { %1516 = dma.done.wait (%p1953_p13), [#allocation3], 256   ;;  %p1954_p10 = pmov %p1953_p13 }
  0x60   : > { %1518 = vsyncadd (%p1954_p10), [#allocation3], 4294967040  ;;  %p1955_p1 = pmov %p1954_p10 }
  0x62   : > { %1520 = dma.done.wait (%p1955_p1), [#allocation6], 272   ;;  %p1956_p2 = pmov %p1955_p1 }
  0x63   : > { %p1957_p3 = pmov %p1955_p1 }
  0x64   : > { %1522 = vsyncadd (%p1956_p2), [#allocation6], 4294967024 }
  0x65   : > { %1524 = dma.done.wait (%p1957_p3), [#allocation9], 528   ;;  %p1958_p12 = pmov %p1955_p1 }
  0x66   : > { %s1746_s25 = sshll.u32 %s1641_s17, 1  ;;  %s1959_s0 = sld [smem:[#allocation22_spill]]  ;;  %v474_v0 = vld [vmem:[#allocation2 + $0x8] sm:$0xff]  ;;  %v681_v1 = vld [vmem:[#allocation5 + $0x8] sm:$0xff]  ;;  %v473_v2 = vld [vmem:[#allocation2] sm:$0xff]  ;;  %vm482_vm0 = vcmask 130048   ;;  %v776_v33 = vlaneseq }
  0x67   : > { %1526 = vsyncadd (%p1958_p12), [#allocation9], 4294966768  ;;  %p451_p4 = scmp.lt.s32.totalorder %s1746_s25, 4  ;;  %1168 = vmatprep.subr.mxu1 %v474_v0  ;;  %1186 = vmatprep.subr.mxu0 %v681_v1  ;;  %v680_v3 = vld [vmem:[#allocation5] sm:$0xff]  ;;  %v773_v6 = vld [vmem:[%s1932_s6 + $0x38] sm:$0xff]  ;;  %v1558_v18 = vmov 0.0  }
  0x68   : > { %1169 = vmatpush3.msra.mxu1 %v474_v0  ;;  %1187 = vmatpush3.msra.mxu0 %v681_v1  ;;  %v569_v7 = vld [vmem:[#allocation10 + $0x18] sm:$0xff]  ;;  %v772_v8 = vld [vmem:[%s1932_s6 + $0x30] sm:$0xff]  ;;  %v771_v9 = vld [vmem:[%s1932_s6 + $0x28] sm:$0xff]  ;;  %vm577_vm1 = vcmask 261120   ;;  %s1778_s22 = sand.u32 1, %s1541_s14   ;;  %v777_v34 = vshrl.u32 %v776_v33, 7 }
  0x69   : > { %s452_s28 = scalar_select %p451_p4, %s1746_s25, 4  ;;  %1170 = vmatprep.subr.mxu1 %v473_v2  ;;  %1188 = vmatprep.subr.mxu0 %v680_v3  ;;  %v568_v10 = vld [vmem:[#allocation10 + $0x10] sm:$0xff]  ;;  %v770_v11 = vld [vmem:[%s1932_s6 + $0x20] sm:$0xff]  ;;  %v567_v13 = vld [vmem:[#allocation10 + $0x8] sm:$0xff]  ;;  %vm677_vm2 = vcmask 326656   ;;  %vm906_vm3 = vcmask 64512  }
  0x6a   : > { %1171 = vmatpush3.msra.mxu1 %v473_v2  ;;  %1189 = vmatpush3.msra.mxu0 %v680_v3  ;;  %v769_v12 = vld [vmem:[%s1932_s6 + $0x18] sm:$0xff]  ;;  %v768_v14 = vld [vmem:[%s1932_s6 + $0x10] sm:$0xff]  ;;  %v767_v15 = vld [vmem:[%s1932_s6 + $0x8] sm:$0xff]  ;;  %v778_v35 = vsub.s32 0, %v777_v34  ;;  %v782_v37 = vsub.s32 1, %v777_v34  ;;  %p1960_p7 = scmp.ne.s32.totalorder %s1947_s23, 0 }
  0x6b   : > { %s1120_s18 = sshll.u32 %s452_s28, 3  ;;  %816 = vmatprep.subr.mxu0 %v773_v6  ;;  %1175 = vmatprep.subr.mxu1 %v569_v7  ;;  %v566_v16 = vld [vmem:[#allocation10] sm:$0xff]  ;;  %v1121_v19 = vld [vmem:[#allocation7] ss:$0 sm:$0xff]  ;;  %v1127_v23 = vld [vmem:[#allocation8] ss:$0 sm:$0xff] }
  0x6c   : > { %s454_s30 = scalar_lea.vmem %s1959_s0, %s1120_s18  ;;  %v766_v17 = vld [vmem:[%s1932_s6] sm:$0xff]  ;;  %s1118_s28 = sshll.u32 %s1778_s22, 5 }
  0x6d   : > { %v471_v4 = vld [vmem:[%s454_s30] sm:$0xff]  ;;  %v472_v5 = vld [vmem:[%s454_s30 + $0x8] sm:$0xff]  ;;  %s1117_s18 = sshll.u32 %s1778_s22, 4  ;;  %s1810_s21 = scalar_lea.vmem [#allocation12], %s1118_s28 }
  0x6e   : > { %1172 = vmatprep.mubr.msk.f32.mxu1 %vm482_vm0, %v471_v4  ;;  %1190 = vmatprep.mubr.msk.f32.mxu0 %vm482_vm0, %v471_v4  ;;  %v774_v36 = vld [vmem:[%s1934_s8] sm:$0x3]  ;;  %s438_s26 = scalar_lea.vmem [#allocation11], %s1117_s18  ;;  %s1942_s30 = scalar_lea.sflag [#allocation4], %s1778_s22 }
  0x6f   : > { %1173 = vmatmul.mubr.msk.f32.vlgmr.msra.gmra.mxu1 %vm482_vm0, %v472_v5  ;;  %1191 = vmatmul.mubr.msk.f32.vlgmr.msra.gmra.mxu0 %vm482_vm0, %v472_v5  ;;  %v779_v38 = vrot.slane %v774_v36, %v778_v35  ;;  %v1124_v39 = vld [vmem:[%s1933_s7] ss:$0 sm:$0xff]  ;;  %v783_v40 = vrot.slane %v774_v36, %v782_v37  ;;  %s924_s20 = ssub.s32 (%p1960_p7), 5, %s1746_s25 }
  0x70   : > { %817 = vmatpush1.msra.mxu0 %v772_v8  ;;  %1176 = vmatpush3.msra.mxu1 %v569_v7  ;;  %p925_p8 = scmp.lt.s32.totalorder (%p1960_p7), %s924_s20, 2 }
  0x71   : > { %818 = vmatprep.subr.mxu0 %v771_v9  ;;  %1177 = vmatprep.subr.mxu1 %v568_v10 }
  0x72   : > { %819 = vmatpush1.msra.mxu0 %v770_v11  ;;  %1178 = vmatpush3.msra.mxu1 %v568_v10 }
  0x73   : > { %820 = vmatprep.subr.mxu0 %v769_v12  ;;  %1179 = vmatprep.subr.mxu1 %v567_v13 }
  0x74   : > { %821 = vmatpush1.msra.mxu0 %v768_v14  ;;  %1180 = vmatpush3.msra.mxu1 %v567_v13 }
  0x75   : > { %822 = vmatprep.subr.mxu0 %v767_v15  ;;  %1181 = vmatprep.subr.mxu1 %v566_v16 }
  0x76   : > { %823 = vmatpush1.msra.mxu0 %v766_v17  ;;  %856 = vmatprep.mubr.f32.mxu0 %v1558_v18 }
  0x77   : > { %1182 = vmatpush3.msra.mxu1 %v566_v16 }
 0x12f   : > { %v1174_v20 = vpop.f32.mrf.mxu1  ;;  %v1192_v21 = vpop.f32.mrf.mxu0 }
 0x130   : > { %v561_v22 = vadd.f32 %v1174_v20, %v1121_v19  ;;  %v761_v29 = vadd.f32 %v1192_v21, %v1127_v23 }
 0x131   : > { %v555_v24 = vpop.f32.mrf.mxu1  ;;  %v755_v25 = vpop.f32.mrf.mxu0 }
 0x132   : > { %v556_v26 = vadd.f32 %v1121_v19, %v555_v24  ;;  %v756_v27 = vadd.f32 %v1127_v23, %v755_v25  ;;  %v565_v28 = vmax.f32 %v561_v22, 0.0  ;;  %v765_v32 = vmax.f32 %v761_v29, 0.0 }
 0x134   : > { %v564_v30 = vmax.f32 %v556_v26, 0.0  ;;  %v764_v31 = vmax.f32 %v756_v27, 0.0 }
 0x136   : > { %1183 = vmatprep.mubr.msk.f32.mxu1 %vm577_vm1, %v564_v30  ;;  %1130 = vmatmul.mubr.msk.f32.vlgmr.msra.gmra.mxu0 %vm577_vm1, %v764_v31 }
 0x137   : > { %1184 = vmatmul.mubr.msk.f32.vlgmr.msra.gmra.mxu1 %vm577_vm1, %v565_v28  ;;  %862 = vmatprep.mubr.f32.mxu0 %v1558_v18 }
 0x13a   : > { %1131 = vmatmul.mubr.msk.f32.gmra.mxu0 %vm577_vm1, %v765_v32 }
 0x1f6   : > { %v858_v41 = vpop.f32.mrf.mxu0 }
 0x1f7   : > { %v1786_v42 = vadd.f32 %v858_v41, %v779_v38  ;;  %v1185_v43 = vpop.f32.mrf.mxu1 }
 0x1f8   : > { %v1788_v44 = vadd.f32 %v1185_v43, %v1124_v39  ;;  %v860_v45 = vpop.f32.mrf.mxu0 }
 0x1f9   : > { %v873_v46 = vand.u32 2147483647, %v1786_v42  ;;  %v1791_v47 = vadd.f32 %v860_v45, %v783_v40  ;;  %v650_v48 = vpop.f32.mrf.mxu1  ;;  %v869_v21 = vmax.f32 %v1786_v42, 0.0 }
 0x1fa   : > { %v662_v49 = vand.u32 2147483647, %v1788_v44  ;;  %v1794_v50 = vadd.f32 %v1124_v39, %v650_v48  ;;  %v864_v51 = vpop.f32.mrf.mxu0  ;;  %v660_v24 = vmax.f32 %v1788_v44, 0.0 }
 0x1fb   : > { %v877_v52 = vsub.f32 0.0, %v873_v46  ;;  %v874_v53 = vand.u32 2147483647, %v1791_v47  ;;  %v1797_v54 = vadd.f32 %v864_v51, %v779_v38  ;;  %v870_v28 = vmax.f32 %v1791_v47, 0.0 }
 0x1fc   : > { %v664_v55 = vsub.f32 0.0, %v662_v49  ;;  %v661_v56 = vand.u32 2147483647, %v1794_v50  ;;  %v866_v57 = vpop.f32.mrf.mxu0  ;;  %v659_v32 = vmax.f32 %v1794_v50, 0.0 }
 0x1fd   : > { %v881_v58 = vmul.f32 1.442695, %v877_v52  ;;  %v878_v59 = vsub.f32 0.0, %v874_v53  ;;  %v875_v60 = vand.u32 2147483647, %v1797_v54  ;;  %v1801_v63 = vadd.f32 %v866_v57, %v783_v40 }
 0x1fe   : > { %v667_v61 = vmul.f32 1.442695, %v664_v55  ;;  %v663_v62 = vsub.f32 0.0, %v661_v56  ;;  %v871_v35 = vmax.f32 %v1797_v54, 0.0 }
 0x1ff   : > { %1293 = vpow2.f32 %v881_v58  ;;  %v883_v0 = vmul.f32 1.442695, %v878_v59  ;;  %v879_v1 = vsub.f32 0.0, %v875_v60  ;;  %v876_v3 = vand.u32 2147483647, %v1801_v63 }
 0x200   : > { %1295 = vpow2.f32 %v667_v61  ;;  %v665_v2 = vmul.f32 1.442695, %v663_v62  ;;  %v872_v40 = vmax.f32 %v1801_v63, 0.0 }
 0x201   : > { %1297 = vpow2.f32 %v883_v0  ;;  %v885_v4 = vmul.f32 1.442695, %v879_v1  ;;  %v880_v5 = vsub.f32 0.0, %v876_v3 }
 0x202   : > { %1299 = vpow2.f32 %v665_v2 }
 0x203   : > { %1301 = vpow2.f32 %v885_v4  ;;  %v887_v6 = vmul.f32 1.442695, %v880_v5 }
 0x205   : > { %1303 = vpow2.f32 %v887_v6 }
 0x20c   : > { %v1294_v7 = vpop.eup %1293 }
 0x20d   : > { %v1296_v8 = vpop.eup %1295  ;;  %v889_v9 = vadd.f32 1.0, %v1294_v7 }
 0x20e   : > { %v1298_v10 = vpop.eup %1297  ;;  %v670_v11 = vadd.f32 1.0, %v1296_v8 }
 0x20f   : > { %v1300_v12 = vpop.eup %1299  ;;  %1305 = vlog2.f32 %v889_v9  ;;  %v890_v13 = vadd.f32 1.0, %v1298_v10 }
 0x210   : > { %v1302_v14 = vpop.eup %1301  ;;  %1307 = vlog2.f32 %v670_v11  ;;  %v669_v15 = vadd.f32 1.0, %v1300_v12 }
 0x211   : > { %1309 = vlog2.f32 %v890_v13  ;;  %v891_v16 = vadd.f32 1.0, %v1302_v14 }
 0x212   : > { %1311 = vlog2.f32 %v669_v15  ;;  %v1304_v17 = vpop.eup %1303 }
 0x213   : > { %1313 = vlog2.f32 %v891_v16  ;;  %v892_v18 = vadd.f32 1.0, %v1304_v17 }
 0x215   : > { %1315 = vlog2.f32 %v892_v18 }
 0x21c   : > { %v1306_v19 = vpop.eup %1305 }
 0x21d   : > { %v1308_v20 = vpop.eup %1307  ;;  %v894_v22 = vmul.f32 0.6931472, %v1306_v19 }
 0x21e   : > { %v1310_v23 = vpop.eup %1309  ;;  %v674_v25 = vmul.f32 0.6931472, %v1308_v20 }
 0x21f   : > { %v1312_v26 = vpop.eup %1311  ;;  %v901_v27 = vadd.f32 %v894_v22, %v869_v21  ;;  %v896_v29 = vmul.f32 0.6931472, %v1310_v23 }
 0x220   : > { %v1314_v30 = vpop.eup %1313  ;;  %v676_v31 = vadd.f32 %v674_v25, %v660_v24  ;;  %v672_v33 = vmul.f32 0.6931472, %v1312_v26 }
 0x221   : > { %905 = vst [vmem:[%s1810_s21] sm:$0xff] %v901_v27  ;;  %v902_v34 = vadd.f32 %v896_v29, %v870_v28  ;;  %v898_v36 = vmul.f32 0.6931472, %v1314_v30 }
 0x222   : > { %679 = vst.msk [vmem:[%s438_s26 + $0x8] sm:$0xff] %vm677_vm2, %v676_v31  ;;  %v675_v37 = vadd.f32 %v672_v33, %v659_v32  ;;  %v1316_v38 = vpop.eup %1315 }
 0x223   : > { %907 = vst.msk [vmem:[%s1810_s21 + $0x8] sm:$0xff] %vm906_vm3, %v902_v34  ;;  %v903_v39 = vadd.f32 %v898_v36, %v871_v35  ;;  %v900_v41 = vmul.f32 0.6931472, %v1316_v38  ;;  %922 = sbr.rel (!%p1960_p7) target bundleno = 580 (0x244), region = 80 }
 0x224   : > { %678 = vst.msk [vmem:[%s438_s26] sm:$0xff] %vm677_vm2, %v675_v37 }
 0x225   : > { %908 = vst [vmem:[%s1810_s21 + $0x10] sm:$0xff] %v903_v39  ;;  %v904_v42 = vadd.f32 %v900_v41, %v872_v40 }
 0x227   : > { %909 = vst.msk [vmem:[%s1810_s21 + $0x18] sm:$0xff] %vm906_vm3, %v904_v42 }
 0x228   : > { %s1972_s20 = smov (!%p925_p8, %s924_s20), 2 }
 0x229   : > { %s1827_s27 = sshll.u32 %s1972_s20, 7 }
 0x22a   : > { %s929_s12 = ssub.s32 256, %s1827_s27 }
 0x22b   : > { %930 = vsyncadd %s1942_s30, %s929_s12  ;;  %p1136_p11 = scmp.ne.s32.totalorder %s1827_s27, 0  ;;  %s1150_s15 = sshll.u32 %s1641_s17, 8 }
 0x22c   : > { %s1837_s28 = scalar_lea.hbm %s1935_s9, %s1150_s15  ;;  %s935_s18 = sshll.u32 %s438_s26, 4  ;;  %s1839_s18 = int_to_ptr.vmem [resolvable:$true] %s935_s18 }
 0x22d   : > { %s1447_s20 = scalar_lea.vmem %s1839_s18, %s1827_s27  ;;  %s1559_s12 = smov [#allocation11]  }
 0x22e   : > { %p1448_p0 = scmp.ne.s32.totalorder %s1839_s18, %s1447_s20  ;;  %s1451_s11 = sshll.u32 %s1559_s12, 4  ;;  %s1452_s11 = int_to_ptr.vmem [resolvable:$false] %s1451_s11 }
 0x22f   : > { %s1453_s30 = scalar_lea.vmem %s1452_s11, 512  ;;  %p1454_p6 = scmp.lt.s32.totalorder %s1839_s18, %s1452_s11 }
 0x230   : > { %p1449_p9 = pnand %p1448_p0, %p1136_p11  ;;  %p1455_p13 = scmp.lt.s32.totalorder %s1453_s30, %s1447_s20 }
 0x232   : > { %p1450_p5 = pneg %p1449_p9  ;;  %p1456_p10 = por %p1455_p13, %p1454_p6 }
 0x234   : > { %p1457_p1 = pnand %p1456_p10, %p1450_p5 }
 0x236   : > { %1460 = shalt.err (!%p1457_p1)
}
 0x237   : > { %s1461_s26 = scalar_lea.hbm %s1837_s28, %s1827_s27  ;;  %s1465_s29 = scalar_lea.hbm %s1935_s9, 640 }
 0x238   : > { %p1462_p2 = scmp.ne.s32.totalorder %s1837_s28, %s1461_s26  ;;  %p1466_p4 = scmp.lt.s32.totalorder %s1837_s28, %s1935_s9 }
 0x239   : > { %p1467_p7 = scmp.lt.s32.totalorder %s1465_s29, %s1461_s26 }
 0x23a   : > { %p1463_p3 = pnand %p1462_p2, %p1136_p11 }
 0x23b   : > { %p1468_p8 = por %p1467_p7, %p1466_p4 }
 0x23c   : > { %p1464_p12 = pneg %p1463_p3 }
 0x23e   : > { %p1469_p0 = pnand %p1468_p8, %p1464_p12 }
 0x240   : > { %1472 = shalt.err (!%p1469_p0)
}
 0x241   : > { %s1560_s30 = smov 128   ;;  %s1561_s20 = smov 8  }
 0x242   : > { %s1961_s0 = scalar_lea.sflag [#allocation4], %s1778_s22 }
 0x243   : > { %941 = dma.vmem_to_hbm [thread:$0]  (%p1136_p11), %s1839_s18, %s1827_s27, %s1837_s28, %s1961_s0, %s1560_s30, %s1560_s30, %s1561_s20  }
 0x244 PF: > { %p1962_p9 = scmp.ne.s32.totalorder %s1947_s23, 0 }
 0x245   : > { %s946_s26 = ssub.s32 (%p1962_p9), 5, %s1746_s25  ;;  %s1963_s29 = scalar_lea.sflag (%p1962_p9), [#allocation13], %s1778_s22 }
 0x246   : > { %944 = sbr.rel (!%p1962_p9) target bundleno = 615 (0x267), region = 84  ;;  %p947_p5 = scmp.lt.s32.totalorder (%p1962_p9), %s946_s26, 2 }
 0x24b   : > { %s1974_s26 = smov (!%p947_p5, %s946_s26), 2 }
 0x24c   : > { %s1869_s15 = sshll.u32 %s1974_s26, 8 }
 0x24d   : > { %s952_s19 = ssub.s32 512, %s1869_s15 }
 0x24e   : > { %953 = vsyncadd %s1963_s29, %s952_s19  ;;  %p1143_p11 = scmp.ne.s32.totalorder %s1869_s15, 0  ;;  %s1153_s0 = sshll.u32 %s1641_s17, 9 }
 0x24f   : > { %s1879_s28 = scalar_lea.hbm %s1936_s10, %s1153_s0  ;;  %s959_s25 = sshll.u32 %s1810_s21, 4  ;;  %s1882_s25 = int_to_ptr.vmem [resolvable:$true] %s959_s25 }
 0x250   : > { %s1473_s18 = scalar_lea.vmem %s1882_s25, %s1869_s15  ;;  %s1562_s12 = smov [#allocation12]  }
 0x251   : > { %p1474_p6 = scmp.ne.s32.totalorder %s1882_s25, %s1473_s18  ;;  %s1477_s11 = sshll.u32 %s1562_s12, 4  ;;  %s1478_s11 = int_to_ptr.vmem [resolvable:$false] %s1477_s11 }
 0x252   : > { %s1479_s17 = scalar_lea.vmem %s1478_s11, 1024  ;;  %p1480_p1 = scmp.lt.s32.totalorder %s1882_s25, %s1478_s11 }
 0x253   : > { %p1475_p13 = pnand %p1474_p6, %p1143_p11  ;;  %p1481_p2 = scmp.lt.s32.totalorder %s1479_s17, %s1473_s18 }
 0x255   : > { %p1476_p10 = pneg %p1475_p13  ;;  %p1482_p3 = por %p1481_p2, %p1480_p1 }
 0x257   : > { %p1483_p12 = pnand %p1482_p3, %p1476_p10 }
 0x259   : > { %1486 = shalt.err (!%p1483_p12)
}
 0x25a   : > { %s1487_s21 = scalar_lea.hbm %s1879_s28, %s1869_s15  ;;  %s1491_s26 = scalar_lea.hbm %s1936_s10, 1280 }
 0x25b   : > { %p1488_p4 = scmp.ne.s32.totalorder %s1879_s28, %s1487_s21  ;;  %p1492_p0 = scmp.lt.s32.totalorder %s1879_s28, %s1936_s10 }
 0x25c   : > { %p1493_p9 = scmp.lt.s32.totalorder %s1491_s26, %s1487_s21 }
 0x25d   : > { %p1489_p7 = pnand %p1488_p4, %p1143_p11 }
 0x25e   : > { %p1494_p5 = por %p1493_p9, %p1492_p0 }
 0x25f   : > { %p1490_p8 = pneg %p1489_p7 }
 0x261   : > { %p1495_p6 = pnand %p1494_p5, %p1490_p8 }
 0x263   : > { %1498 = shalt.err (!%p1495_p6)
}
 0x264   : > { %s1563_s0 = smov 256   ;;  %s1564_s23 = smov 16  }
 0x265   : > { %s1964_s27 = scalar_lea.sflag [#allocation13], %s1778_s22 }
 0x266   : > { %965 = dma.vmem_to_hbm [thread:$0]  (%p1143_p11), %s1882_s25, %s1869_s15, %s1879_s28, %s1964_s27, %s1563_s0, %s1563_s0, %s1564_s23  }
 0x267 PF: > { %p1248_p13 = scmp.ge.s32.totalorder %s1549_s16, 2  ;;  %s974_s18 = sand.u32 1, %s1537_s13  }
 0x268   : > { %p1965_p10 = scmp.ne.s32.totalorder %s1948_s24, 0  ;;  %s975_s12 = scalar_lea.sflag [#allocation4], %s974_s18 }
 0x26a   : > { %p1232_p1 = pnand %p1248_p13, %p1965_p10 }
 0x26c   : > { %p1233_p2 = pneg %p1232_p1 }
 0x26e   : > { %1528 = dma.done.wait (%p1233_p2), %s975_s12, 256  }
 0x26f   : > { %1530 = vsyncadd (%p1233_p2), %s975_s12, 4294967040  ;;  %s984_s11 = scalar_lea.sflag [#allocation13], %s974_s18 }
 0x270   : > { %1532 = dma.done.wait (%p1233_p2), %s984_s11, 512  }
 0x271   : > { %1534 = vsyncadd (%p1233_p2), %s984_s11, 4294966784  ;;  %s1966_s16 = sld [smem:[#allocation20_spill]]  ;;  %s1969_s13 = smov %s1541_s14 }
 0x272   : > { %s1967_s22 = sld [smem:[#allocation19_spill]] }
 0x273   : > { %s1968_s15 = sld [smem:[#allocation21_spill]] }
 0x277   : > { %p27_p11 = scmp.ge.s32.totalorder %s1966_s16, 5  }
 0x278   : > { %s1970_s14 = smov %s1967_s22 }
 0x279   :  { %29 = sbr.rel (!%p27_p11) target bundleno = 10 (0xa), region = 129 }
 0x27e   :  { %989 = vsyncpa [#allocation3], 1 }
 0x27f   :  { %991 = vsyncpa [#allocation3 + $0x1], 1 }
 0x280   :  { %992 = vsyncpa [#allocation6], 1 }
 0x281   :  { %993 = vsyncpa [#allocation9], 1 }
 0x282   :  { %994 = vsyncpa [#allocation4], 1 }
 0x283   :  { %996 = vsyncpa [#allocation4 + $0x1], 1 }
 0x284   :  { %997 = vsyncpa [#allocation13], 1 }
 0x285   :  { %999 = vsyncpa [#allocation13 + $0x1], 1 }

// kernel: tpu_custom_call.1
= control target key start
LH: loop header
LB: loop body
LE: loop exit
PB: predicated region body
PF: predicated region fallthrough
CT: control target
= control target key end

     0   :  { %s1926_s0 = inlined_call_operand.vmem [shape: f32[40,16], index: 0, kind: input, shape index: {}]   ;;  %s1927_s1 = inlined_call_operand.hbm [shape: f32[16,32], index: 1, kind: input, shape index: {}]   ;;  %s1928_s2 = inlined_call_operand.hbm [shape: f32[16,32], index: 2, kind: input, shape index: {}]   ;;  %s1929_s3 = inlined_call_operand.hbm [shape: f32[1,32], index: 3, kind: input, shape index: {}]   ;;  %s1930_s4 = inlined_call_operand.hbm [shape: f32[1,32], index: 4, kind: input, shape index: {}]   ;;  %s1931_s5 = inlined_call_operand.hbm [shape: f32[32,40], index: 5, kind: input, shape index: {}]   ;;  %s1932_s6 = inlined_call_operand.vmem [shape: f32[32,136], index: 6, kind: input, shape index: {}]   ;;  %s1933_s7 = inlined_call_operand.vmem [shape: f32[1,40], index: 7, kind: input, shape index: {}]   ;;  %s1934_s8 = inlined_call_operand.vmem [shape: f32[1,136], index: 8, kind: input, shape index: {}]   ;;  %s1935_s9 = inlined_call_operand.hbm [shape: f32[40,40], index: 9, kind: output, shape index: {0}]   ;;  %s1936_s10 = inlined_call_operand.hbm [shape: f32[40,136], index: 10, kind: output, shape index: {1}]  }
   0x1   :  { %1943 = sst [smem:[#allocation22_spill]] %s1926_s0 }
   0x2   :  { %16 = vsyncpa [#allocation3], 0 }
   0x3   :  { %17 = vsyncpa [#allocation6], 0 }
   0x4   :  { %18 = vsyncpa [#allocation9], 0 }
   0x5   :  { %19 = vsyncpa [#allocation4], 0 }
   0x6   :  { %21 = vsyncpa [#allocation4 + $0x1], 0 }
   0x7   :  { %22 = vsyncpa [#allocation13], 0 }
   0x8   :  { %24 = vsyncpa [#allocation13 + $0x1], 0  ;;  %s1620_s13 = smov 0   ;;  %s1622_s14 = smov 0  }
   0x9   :  { %s1624_s15 = smov 0   ;;  %s1626_s16 = smov 0  }
   0xa LB: > { %1944 = sst [smem:[#allocation19_spill]] %s1545_s15  ;;  %s1641_s17 = sadd.s32 4294967295, %s1549_s16   ;;  %s1549_s16 = sphi %s1626_s16, %s1966_s16   ;;  %s1545_s15 = sphi %s1624_s15, %s1968_s15   ;;  %s1541_s14 = sphi %s1622_s14, %s1970_s14   ;;  %s1537_s13 = sphi %s1620_s13, %s1969_s13  }
   0xb   : > { %s1103_s18 = sadd.s32 4294967294, %s1549_s16   ;;  %s1645_s19 = sadd.s32 1, %s1549_s16  }
   0xc   : > { %1945 = sst [smem:[#allocation20_spill]] %s1645_s19  ;;  %s231_s20 = sadd.s32 1, %s1545_s15 }
   0xd   : > { %s228_s21 = ssub.s32 %s1549_s16, %s1645_s19  ;;  %p241_p0 = scmp.ne.s32.totalorder %s1545_s15, %s1541_s14 }
   0xe   : > { %p229_p1 = scmp.eq.s32.totalorder %s228_s21, 0  ;;  %p242_p2 = scmp.eq.s32.totalorder %s1641_s17, 2 }
   0xf   : > { %p247_p3 = scmp.ne.s32.totalorder %s1541_s14, %s1537_s13  ;;  %p248_p4 = scmp.eq.s32.totalorder %s1103_s18, 2 }
  0x10   : > { %s1656_s22 = scalar_select %p229_p1, %s1545_s15, %s231_s20  }
  0x11   : > { %p1658_p5 = por %p242_p2, %p241_p0  ;;  %p1662_p6 = por %p248_p4, %p247_p3 }
  0x12   : > { %1946 = sst [smem:[#allocation21_spill]] %s1656_s22  ;;  %p1104_p7 = scmp.ge.s32.totalorder %s1549_s16, 1 }
  0x13   : > { %s1947_s23 = scalar_select %p1658_p5, 1, 0 }
  0x14   : > { %s1948_s24 = scalar_select %p1662_p6, 1, 0 }
  0x15   : > { %p281_p8 = scmp.lt.s32.totalorder %s1549_s16, 4  ;;  %p1940_p9 = scmp.eq.s32.totalorder %s1641_s17, 0 }
  0x16   : > { %s1551_s26 = smov [#allocation5]   ;;  %s1552_s29 = smov [#allocation8]  }
  0x17   : > { %p1669_p10 = pnand %p1104_p7, %p281_p8  ;;  %s306_s27 = sshll.u32 %s1551_s26, 4  ;;  %s307_s27 = int_to_ptr.vmem [resolvable:$true] %s306_s27 }
  0x18   : > { %s331_s30 = sshll.u32 %s1552_s29, 4  ;;  %s1553_s11 = smov [#allocation2]   ;;  %s332_s30 = int_to_ptr.vmem [resolvable:$true] %s331_s30 }
  0x19   : > { %s1949_s25 = scalar_select %p1669_p10, 1, 0 }
  0x1a   : > { %p1215_p11 = pneg %p1669_p10  ;;  %s293_s12 = sshll.u32 %s1553_s11, 4  ;;  %s294_s12 = int_to_ptr.vmem [resolvable:$true] %s293_s12 }
  0x1b   : > { %s1328_s20 = scalar_lea.vmem %s307_s27, 256  ;;  %p1336_p3 = scmp.lt.s32.totalorder %s307_s27, %s307_s27 }
  0x1c   : > { %p1677_p12 = pnand %p1940_p9, %p1215_p11  ;;  %p1329_p0 = scmp.ne.s32.totalorder %s307_s27, %s1328_s20 }
  0x1d   : > { %p1337_p4 = scmp.lt.s32.totalorder %s1328_s20, %s1328_s20 }
  0x1e   : > { %p1683_p13 = pneg %p1677_p12 }
  0x1f   : > { %p1338_p7 = por %p1337_p4, %p1336_p3 }
  0x20   : > { %p1331_p1 = pnand %p1329_p0, %p1683_p13 }
  0x22   : > { %p1332_p2 = pneg %p1331_p1 }
  0x24   : > { %p1339_p8 = pnand %p1338_p7, %p1332_p2 }
  0x26   : > { %1342 = shalt.err (!%p1339_p8)
}
  0x27   : > { %s1554_s21 = smov 128   ;;  %s1555_s26 = smov 8  }
  0x28   : > { %1221 = dma.hbm_to_vmem [thread:$0]  (!%p1677_p12), %s1928_s2, 256, %s307_s27, [#allocation6], %s1554_s21, %s1554_s21, %s1555_s26  }
  0x29   : > { %s1354_s22 = scalar_lea.vmem %s332_s30, 16  ;;  %s1361_s20 = scalar_lea.vmem %s332_s30, 32 }
  0x2a   : > { %p1355_p11 = scmp.ne.s32.totalorder %s332_s30, %s1354_s22  ;;  %p1362_p2 = scmp.lt.s32.totalorder %s332_s30, %s332_s30 }
  0x2b   : > { %p1363_p3 = scmp.lt.s32.totalorder %s1361_s20, %s1354_s22 }
  0x2c   : > { %p1357_p0 = pnand %p1355_p11, %p1683_p13 }
  0x2d   : > { %p1364_p4 = por %p1363_p3, %p1362_p2 }
  0x2e   : > { %p1358_p1 = pneg %p1357_p0 }
  0x30   : > { %p1365_p7 = pnand %p1364_p4, %p1358_p1 }
  0x32   : > { %1368 = shalt.err (!%p1365_p7)
}
  0x33   : > { %1227 = dma.hbm_to_vmem [thread:$0]  (!%p1677_p12), %s1930_s4, 16, %s332_s30, [#allocation9]  }
  0x34   : > { %s1380_s27 = scalar_lea.vmem %s294_s12, 256  ;;  %p1388_p0 = scmp.lt.s32.totalorder %s294_s12, %s294_s12 }
  0x35   : > { %p1381_p8 = scmp.ne.s32.totalorder %s294_s12, %s1380_s27  ;;  %p1389_p6 = scmp.lt.s32.totalorder %s1380_s27, %s1380_s27 }
  0x37   : > { %p1383_p9 = pnand %p1381_p8, %p1683_p13  ;;  %p1390_p5 = por %p1389_p6, %p1388_p0 }
  0x39   : > { %p1384_p11 = pneg %p1383_p9 }
  0x3b   : > { %p1391_p10 = pnand %p1390_p5, %p1384_p11 }
  0x3d   : > { %1394 = shalt.err (!%p1391_p10)
}
  0x3e   : > { %1218 = dma.hbm_to_vmem [thread:$0]  (!%p1677_p12), %s1927_s1, 256, %s294_s12, [#allocation3], %s1554_s21, %s1554_s21, %s1555_s26  }
  0x3f   : > { %s1556_s19 = smov [#allocation7]   ;;  %s1557_s29 = smov [#allocation10]  }
  0x40   : > { %s320_s30 = sshll.u32 %s1556_s19, 4  ;;  %s341_s11 = sshll.u32 %s1557_s29, 4  ;;  %s321_s30 = int_to_ptr.vmem [resolvable:$true] %s320_s30  ;;  %s342_s11 = int_to_ptr.vmem [resolvable:$true] %s341_s11 }
  0x41   : > { %s1406_s20 = scalar_lea.vmem %s321_s30, 16  ;;  %s1413_s27 = scalar_lea.vmem %s321_s30, 32 }
  0x42   : > { %p1407_p9 = scmp.ne.s32.totalorder %s321_s30, %s1406_s20  ;;  %p1414_p10 = scmp.lt.s32.totalorder %s321_s30, %s321_s30 }
  0x43   : > { %p1415_p1 = scmp.lt.s32.totalorder %s1413_s27, %s1406_s20 }
  0x44   : > { %p1409_p5 = pnand %p1407_p9, %p1683_p13 }
  0x45   : > { %p1416_p2 = por %p1415_p1, %p1414_p10 }
  0x46   : > { %p1410_p6 = pneg %p1409_p5 }
  0x48   : > { %p1417_p3 = pnand %p1416_p2, %p1410_p6 }
  0x4a   : > { %1420 = shalt.err (!%p1417_p3)
}
  0x4b   : > { %1224 = dma.hbm_to_vmem [thread:$0]  (!%p1677_p12), %s1929_s3, 16, %s321_s30, [#allocation6]  }
  0x4c   : > { %s1432_s15 = scalar_lea.vmem %s342_s11, 512  ;;  %p1440_p11 = scmp.lt.s32.totalorder %s342_s11, %s342_s11 }
  0x4d   : > { %p1433_p4 = scmp.ne.s32.totalorder %s342_s11, %s1432_s15  ;;  %p1441_p0 = scmp.lt.s32.totalorder %s1432_s15, %s1432_s15 }
  0x4f   : > { %p1435_p7 = pnand %p1433_p4, %p1683_p13  ;;  %p1442_p9 = por %p1441_p0, %p1440_p11 }
  0x51   : > { %p1436_p8 = pneg %p1435_p7 }
  0x53   : > { %p1443_p5 = pnand %p1442_p9, %p1436_p8 }
  0x55   : > { %1446 = shalt.err (!%p1443_p5)
}
  0x56   : > { %1230 = dma.hbm_to_vmem [thread:$0]  (!%p1677_p12), %s1931_s5, 512, %s342_s11, [#allocation9], %s1554_s21, %s1554_s21, %s1555_s26  }
  0x57   : > { %p1952_p6 = scmp.ne.s32.totalorder %s1949_s25, 0 }
  0x58   : > { %p1953_p13 = scmp.eq.s32.totalorder (!%p1952_p6), %s1641_s17, 0 }
  0x59   : > { %383 = sbr.rel (%p1952_p6) target bundleno = 615 (0x267), region = 56 }
  0x5e   : > { %1516 = dma.done.wait (%p1953_p13), [#allocation3], 256   ;;  %p1954_p10 = pmov %p1953_p13 }
  0x60   : > { %1518 = vsyncadd (%p1954_p10), [#allocation3], 4294967040  ;;  %p1955_p1 = pmov %p1954_p10 }
  0x62   : > { %1520 = dma.done.wait (%p1955_p1), [#allocation6], 272   ;;  %p1956_p2 = pmov %p1955_p1 }
  0x63   : > { %p1957_p3 = pmov %p1955_p1 }
  0x64   : > { %1522 = vsyncadd (%p1956_p2), [#allocation6], 4294967024 }
  0x65   : > { %1524 = dma.done.wait (%p1957_p3), [#allocation9], 528   ;;  %p1958_p12 = pmov %p1955_p1 }
  0x66   : > { %s1746_s25 = sshll.u32 %s1641_s17, 1  ;;  %s1959_s0 = sld [smem:[#allocation22_spill]]  ;;  %v474_v0 = vld [vmem:[#allocation2 + $0x8] sm:$0xff]  ;;  %v681_v1 = vld [vmem:[#allocation5 + $0x8] sm:$0xff]  ;;  %v473_v2 = vld [vmem:[#allocation2] sm:$0xff]  ;;  %vm482_vm0 = vcmask 130048   ;;  %v776_v33 = vlaneseq }
  0x67   : > { %1526 = vsyncadd (%p1958_p12), [#allocation9], 4294966768  ;;  %p451_p4 = scmp.lt.s32.totalorder %s1746_s25, 4  ;;  %1168 = vmatprep.subr.mxu1 %v474_v0  ;;  %1186 = vmatprep.subr.mxu0 %v681_v1  ;;  %v680_v3 = vld [vmem:[#allocation5] sm:$0xff]  ;;  %v773_v6 = vld [vmem:[%s1932_s6 + $0x38] sm:$0xff]  ;;  %v1558_v18 = vmov 0.0  }
  0x68   : > { %1169 = vmatpush3.msra.mxu1 %v474_v0  ;;  %1187 = vmatpush3.msra.mxu0 %v681_v1  ;;  %v569_v7 = vld [vmem:[#allocation10 + $0x18] sm:$0xff]  ;;  %v772_v8 = vld [vmem:[%s1932_s6 + $0x30] sm:$0xff]  ;;  %v771_v9 = vld [vmem:[%s1932_s6 + $0x28] sm:$0xff]  ;;  %vm577_vm1 = vcmask 261120   ;;  %s1778_s22 = sand.u32 1, %s1541_s14   ;;  %v777_v34 = vshrl.u32 %v776_v33, 7 }
  0x69   : > { %s452_s28 = scalar_select %p451_p4, %s1746_s25, 4  ;;  %1170 = vmatprep.subr.mxu1 %v473_v2  ;;  %1188 = vmatprep.subr.mxu0 %v680_v3  ;;  %v568_v10 = vld [vmem:[#allocation10 + $0x10] sm:$0xff]  ;;  %v770_v11 = vld [vmem:[%s1932_s6 + $0x20] sm:$0xff]  ;;  %v567_v13 = vld [vmem:[#allocation10 + $0x8] sm:$0xff]  ;;  %vm677_vm2 = vcmask 326656   ;;  %vm906_vm3 = vcmask 64512  }
  0x6a   : > { %1171 = vmatpush3.msra.mxu1 %v473_v2  ;;  %1189 = vmatpush3.msra.mxu0 %v680_v3  ;;  %v769_v12 = vld [vmem:[%s1932_s6 + $0x18] sm:$0xff]  ;;  %v768_v14 = vld [vmem:[%s1932_s6 + $0x10] sm:$0xff]  ;;  %v767_v15 = vld [vmem:[%s1932_s6 + $0x8] sm:$0xff]  ;;  %v778_v35 = vsub.s32 0, %v777_v34  ;;  %v782_v37 = vsub.s32 1, %v777_v34  ;;  %p1960_p7 = scmp.ne.s32.totalorder %s1947_s23, 0 }
  0x6b   : > { %s1120_s18 = sshll.u32 %s452_s28, 3  ;;  %816 = vmatprep.subr.mxu0 %v773_v6  ;;  %1175 = vmatprep.subr.mxu1 %v569_v7  ;;  %v566_v16 = vld [vmem:[#allocation10] sm:$0xff]  ;;  %v1121_v19 = vld [vmem:[#allocation7] ss:$0 sm:$0xff]  ;;  %v1127_v23 = vld [vmem:[#allocation8] ss:$0 sm:$0xff] }
  0x6c   : > { %s454_s30 = scalar_lea.vmem %s1959_s0, %s1120_s18  ;;  %v766_v17 = vld [vmem:[%s1932_s6] sm:$0xff]  ;;  %s1118_s28 = sshll.u32 %s1778_s22, 5 }
  0x6d   : > { %v471_v4 = vld [vmem:[%s454_s30] sm:$0xff]  ;;  %v472_v5 = vld [vmem:[%s454_s30 + $0x8] sm:$0xff]  ;;  %s1117_s18 = sshll.u32 %s1778_s22, 4  ;;  %s1810_s21 = scalar_lea.vmem [#allocation12], %s1118_s28 }
  0x6e   : > { %1172 = vmatprep.mubr.msk.f32.mxu1 %vm482_vm0, %v471_v4  ;;  %1190 = vmatprep.mubr.msk.f32.mxu0 %vm482_vm0, %v471_v4  ;;  %v774_v36 = vld [vmem:[%s1934_s8] sm:$0x3]  ;;  %s438_s26 = scalar_lea.vmem [#allocation11], %s1117_s18  ;;  %s1942_s30 = scalar_lea.sflag [#allocation4], %s1778_s22 }
  0x6f   : > { %1173 = vmatmul.mubr.msk.f32.vlgmr.msra.gmra.mxu1 %vm482_vm0, %v472_v5  ;;  %1191 = vmatmul.mubr.msk.f32.vlgmr.msra.gmra.mxu0 %vm482_vm0, %v472_v5  ;;  %v779_v38 = vrot.slane %v774_v36, %v778_v35  ;;  %v1124_v39 = vld [vmem:[%s1933_s7] ss:$0 sm:$0xff]  ;;  %v783_v40 = vrot.slane %v774_v36, %v782_v37  ;;  %s924_s20 = ssub.s32 (%p1960_p7), 5, %s1746_s25 }
  0x70   : > { %817 = vmatpush1.msra.mxu0 %v772_v8  ;;  %1176 = vmatpush3.msra.mxu1 %v569_v7  ;;  %p925_p8 = scmp.lt.s32.totalorder (%p1960_p7), %s924_s20, 2 }
  0x71   : > { %818 = vmatprep.subr.mxu0 %v771_v9  ;;  %1177 = vmatprep.subr.mxu1 %v568_v10 }
  0x72   : > { %819 = vmatpush1.msra.mxu0 %v770_v11  ;;  %1178 = vmatpush3.msra.mxu1 %v568_v10 }
  0x73   : > { %820 = vmatprep.subr.mxu0 %v769_v12  ;;  %1179 = vmatprep.subr.mxu1 %v567_v13 }
  0x74   : > { %821 = vmatpush1.msra.mxu0 %v768_v14  ;;  %1180 = vmatpush3.msra.mxu1 %v567_v13 }
  0x75   : > { %822 = vmatprep.subr.mxu0 %v767_v15  ;;  %1181 = vmatprep.subr.mxu1 %v566_v16 }
  0x76   : > { %823 = vmatpush1.msra.mxu0 %v766_v17  ;;  %856 = vmatprep.mubr.f32.mxu0 %v1558_v18 }
  0x77   : > { %1182 = vmatpush3.msra.mxu1 %v566_v16 }
 0x12f   : > { %v1174_v20 = vpop.f32.mrf.mxu1  ;;  %v1192_v21 = vpop.f32.mrf.mxu0 }
 0x130   : > { %v561_v22 = vadd.f32 %v1174_v20, %v1121_v19  ;;  %v761_v29 = vadd.f32 %v1192_v21, %v1127_v23 }
 0x131   : > { %v555_v24 = vpop.f32.mrf.mxu1  ;;  %v755_v25 = vpop.f32.mrf.mxu0 }
 0x132   : > { %v556_v26 = vadd.f32 %v1121_v19, %v555_v24  ;;  %v756_v27 = vadd.f32 %v1127_v23, %v755_v25  ;;  %v565_v28 = vmax.f32 %v561_v22, 0.0  ;;  %v765_v32 = vmax.f32 %v761_v29, 0.0 }
 0x134   : > { %v564_v30 = vmax.f32 %v556_v26, 0.0  ;;  %v764_v31 = vmax.f32 %v756_v27, 0.0 }
 0x136   : > { %1183 = vmatprep.mubr.msk.f32.mxu1 %vm577_vm1, %v564_v30  ;;  %1130 = vmatmul.mubr.msk.f32.vlgmr.msra.gmra.mxu0 %vm577_vm1, %v764_v31 }
 0x137   : > { %1184 = vmatmul.mubr.msk.f32.vlgmr.msra.gmra.mxu1 %vm577_vm1, %v565_v28  ;;  %862 = vmatprep.mubr.f32.mxu0 %v1558_v18 }
 0x13a   : > { %1131 = vmatmul.mubr.msk.f32.gmra.mxu0 %vm577_vm1, %v765_v32 }
 0x1f6   : > { %v858_v41 = vpop.f32.mrf.mxu0 }
 0x1f7   : > { %v1786_v42 = vadd.f32 %v858_v41, %v779_v38  ;;  %v1185_v43 = vpop.f32.mrf.mxu1 }
 0x1f8   : > { %v1788_v44 = vadd.f32 %v1185_v43, %v1124_v39  ;;  %v860_v45 = vpop.f32.mrf.mxu0 }
 0x1f9   : > { %v873_v46 = vand.u32 2147483647, %v1786_v42  ;;  %v1791_v47 = vadd.f32 %v860_v45, %v783_v40  ;;  %v650_v48 = vpop.f32.mrf.mxu1  ;;  %v869_v21 = vmax.f32 %v1786_v42, 0.0 }
 0x1fa   : > { %v662_v49 = vand.u32 2147483647, %v1788_v44  ;;  %v1794_v50 = vadd.f32 %v1124_v39, %v650_v48  ;;  %v864_v51 = vpop.f32.mrf.mxu0  ;;  %v660_v24 = vmax.f32 %v1788_v44, 0.0 }
 0x1fb   : > { %v877_v52 = vsub.f32 0.0, %v873_v46  ;;  %v874_v53 = vand.u32 2147483647, %v1791_v47  ;;  %v1797_v54 = vadd.f32 %v864_v51, %v779_v38  ;;  %v870_v28 = vmax.f32 %v1791_v47, 0.0 }
 0x1fc   : > { %v664_v55 = vsub.f32 0.0, %v662_v49  ;;  %v661_v56 = vand.u32 2147483647, %v1794_v50  ;;  %v866_v57 = vpop.f32.mrf.mxu0  ;;  %v659_v32 = vmax.f32 %v1794_v50, 0.0 }
 0x1fd   : > { %v881_v58 = vmul.f32 1.442695, %v877_v52  ;;  %v878_v59 = vsub.f32 0.0, %v874_v53  ;;  %v875_v60 = vand.u32 2147483647, %v1797_v54  ;;  %v1801_v63 = vadd.f32 %v866_v57, %v783_v40 }
 0x1fe   : > { %v667_v61 = vmul.f32 1.442695, %v664_v55  ;;  %v663_v62 = vsub.f32 0.0, %v661_v56  ;;  %v871_v35 = vmax.f32 %v1797_v54, 0.0 }
 0x1ff   : > { %1293 = vpow2.f32 %v881_v58  ;;  %v883_v0 = vmul.f32 1.442695, %v878_v59  ;;  %v879_v1 = vsub.f32 0.0, %v875_v60  ;;  %v876_v3 = vand.u32 2147483647, %v1801_v63 }
 0x200   : > { %1295 = vpow2.f32 %v667_v61  ;;  %v665_v2 = vmul.f32 1.442695, %v663_v62  ;;  %v872_v40 = vmax.f32 %v1801_v63, 0.0 }
 0x201   : > { %1297 = vpow2.f32 %v883_v0  ;;  %v885_v4 = vmul.f32 1.442695, %v879_v1  ;;  %v880_v5 = vsub.f32 0.0, %v876_v3 }
 0x202   : > { %1299 = vpow2.f32 %v665_v2 }
 0x203   : > { %1301 = vpow2.f32 %v885_v4  ;;  %v887_v6 = vmul.f32 1.442695, %v880_v5 }
 0x205   : > { %1303 = vpow2.f32 %v887_v6 }
 0x20c   : > { %v1294_v7 = vpop.eup %1293 }
 0x20d   : > { %v1296_v8 = vpop.eup %1295  ;;  %v889_v9 = vadd.f32 1.0, %v1294_v7 }
 0x20e   : > { %v1298_v10 = vpop.eup %1297  ;;  %v670_v11 = vadd.f32 1.0, %v1296_v8 }
 0x20f   : > { %v1300_v12 = vpop.eup %1299  ;;  %1305 = vlog2.f32 %v889_v9  ;;  %v890_v13 = vadd.f32 1.0, %v1298_v10 }
 0x210   : > { %v1302_v14 = vpop.eup %1301  ;;  %1307 = vlog2.f32 %v670_v11  ;;  %v669_v15 = vadd.f32 1.0, %v1300_v12 }
 0x211   : > { %1309 = vlog2.f32 %v890_v13  ;;  %v891_v16 = vadd.f32 1.0, %v1302_v14 }
 0x212   : > { %1311 = vlog2.f32 %v669_v15  ;;  %v1304_v17 = vpop.eup %1303 }
 0x213   : > { %1313 = vlog2.f32 %v891_v16  ;;  %v892_v18 = vadd.f32 1.0, %v1304_v17 }
 0x215   : > { %1315 = vlog2.f32 %v892_v18 }
 0x21c   : > { %v1306_v19 = vpop.eup %1305 }
 0x21d   : > { %v1308_v20 = vpop.eup %1307  ;;  %v894_v22 = vmul.f32 0.6931472, %v1306_v19 }
 0x21e   : > { %v1310_v23 = vpop.eup %1309  ;;  %v674_v25 = vmul.f32 0.6931472, %v1308_v20 }
 0x21f   : > { %v1312_v26 = vpop.eup %1311  ;;  %v901_v27 = vadd.f32 %v894_v22, %v869_v21  ;;  %v896_v29 = vmul.f32 0.6931472, %v1310_v23 }
 0x220   : > { %v1314_v30 = vpop.eup %1313  ;;  %v676_v31 = vadd.f32 %v674_v25, %v660_v24  ;;  %v672_v33 = vmul.f32 0.6931472, %v1312_v26 }
 0x221   : > { %905 = vst [vmem:[%s1810_s21] sm:$0xff] %v901_v27  ;;  %v902_v34 = vadd.f32 %v896_v29, %v870_v28  ;;  %v898_v36 = vmul.f32 0.6931472, %v1314_v30 }
 0x222   : > { %679 = vst.msk [vmem:[%s438_s26 + $0x8] sm:$0xff] %vm677_vm2, %v676_v31  ;;  %v675_v37 = vadd.f32 %v672_v33, %v659_v32  ;;  %v1316_v38 = vpop.eup %1315 }
 0x223   : > { %907 = vst.msk [vmem:[%s1810_s21 + $0x8] sm:$0xff] %vm906_vm3, %v902_v34  ;;  %v903_v39 = vadd.f32 %v898_v36, %v871_v35  ;;  %v900_v41 = vmul.f32 0.6931472, %v1316_v38  ;;  %922 = sbr.rel (!%p1960_p7) target bundleno = 580 (0x244), region = 80 }
 0x224   : > { %678 = vst.msk [vmem:[%s438_s26] sm:$0xff] %vm677_vm2, %v675_v37 }
 0x225   : > { %908 = vst [vmem:[%s1810_s21 + $0x10] sm:$0xff] %v903_v39  ;;  %v904_v42 = vadd.f32 %v900_v41, %v872_v40 }
 0x227   : > { %909 = vst.msk [vmem:[%s1810_s21 + $0x18] sm:$0xff] %vm906_vm3, %v904_v42 }
 0x228   : > { %s1972_s20 = smov (!%p925_p8, %s924_s20), 2 }
 0x229   : > { %s1827_s27 = sshll.u32 %s1972_s20, 7 }
 0x22a   : > { %s929_s12 = ssub.s32 256, %s1827_s27 }
 0x22b   : > { %930 = vsyncadd %s1942_s30, %s929_s12  ;;  %p1136_p11 = scmp.ne.s32.totalorder %s1827_s27, 0  ;;  %s1150_s15 = sshll.u32 %s1641_s17, 8 }
 0x22c   : > { %s1837_s28 = scalar_lea.hbm %s1935_s9, %s1150_s15  ;;  %s935_s18 = sshll.u32 %s438_s26, 4  ;;  %s1839_s18 = int_to_ptr.vmem [resolvable:$true] %s935_s18 }
 0x22d   : > { %s1447_s20 = scalar_lea.vmem %s1839_s18, %s1827_s27  ;;  %s1559_s12 = smov [#allocation11]  }
 0x22e   : > { %p1448_p0 = scmp.ne.s32.totalorder %s1839_s18, %s1447_s20  ;;  %s1451_s11 = sshll.u32 %s1559_s12, 4  ;;  %s1452_s11 = int_to_ptr.vmem [resolvable:$false] %s1451_s11 }
 0x22f   : > { %s1453_s30 = scalar_lea.vmem %s1452_s11, 512  ;;  %p1454_p6 = scmp.lt.s32.totalorder %s1839_s18, %s1452_s11 }
 0x230   : > { %p1449_p9 = pnand %p1448_p0, %p1136_p11  ;;  %p1455_p13 = scmp.lt.s32.totalorder %s1453_s30, %s1447_s20 }
 0x232   : > { %p1450_p5 = pneg %p1449_p9  ;;  %p1456_p10 = por %p1455_p13, %p1454_p6 }
 0x234   : > { %p1457_p1 = pnand %p1456_p10, %p1450_p5 }
 0x236   : > { %1460 = shalt.err (!%p1457_p1)
}
 0x237   : > { %s1461_s26 = scalar_lea.hbm %s1837_s28, %s1827_s27  ;;  %s1465_s29 = scalar_lea.hbm %s1935_s9, 640 }
 0x238   : > { %p1462_p2 = scmp.ne.s32.totalorder %s1837_s28, %s1461_s26  ;;  %p1466_p4 = scmp.lt.s32.totalorder %s1837_s28, %s1935_s9 }
 0x239   : > { %p1467_p7 = scmp.lt.s32.totalorder %s1465_s29, %s1461_s26 }
 0x23a   : > { %p1463_p3 = pnand %p1462_p2, %p1136_p11 }
 0x23b   : > { %p1468_p8 = por %p1467_p7, %p1466_p4 }
 0x23c   : > { %p1464_p12 = pneg %p1463_p3 }
 0x23e   : > { %p1469_p0 = pnand %p1468_p8, %p1464_p12 }
 0x240   : > { %1472 = shalt.err (!%p1469_p0)
}
 0x241   : > { %s1560_s30 = smov 128   ;;  %s1561_s20 = smov 8  }
 0x242   : > { %s1961_s0 = scalar_lea.sflag [#allocation4], %s1778_s22 }
 0x243   : > { %941 = dma.vmem_to_hbm [thread:$0]  (%p1136_p11), %s1839_s18, %s1827_s27, %s1837_s28, %s1961_s0, %s1560_s30, %s1560_s30, %s1561_s20  }
 0x244 PF: > { %p1962_p9 = scmp.ne.s32.totalorder %s1947_s23, 0 }
 0x245   : > { %s946_s26 = ssub.s32 (%p1962_p9), 5, %s1746_s25  ;;  %s1963_s29 = scalar_lea.sflag (%p1962_p9), [#allocation13], %s1778_s22 }
 0x246   : > { %944 = sbr.rel (!%p1962_p9) target bundleno = 615 (0x267), region = 84  ;;  %p947_p5 = scmp.lt.s32.totalorder (%p1962_p9), %s946_s26, 2 }
 0x24b   : > { %s1974_s26 = smov (!%p947_p5, %s946_s26), 2 }
 0x24c   : > { %s1869_s15 = sshll.u32 %s1974_s26, 8 }
 0x24d   : > { %s952_s19 = ssub.s32 512, %s1869_s15 }
 0x24e   : > { %953 = vsyncadd %s1963_s29, %s952_s19  ;;  %p1143_p11 = scmp.ne.s32.totalorder %s1869_s15, 0  ;;  %s1153_s0 = sshll.u32 %s1641_s17, 9 }
 0x24f   : > { %s1879_s28 = scalar_lea.hbm %s1936_s10, %s1153_s0  ;;  %s959_s25 = sshll.u32 %s1810_s21, 4  ;;  %s1882_s25 = int_to_ptr.vmem [resolvable:$true] %s959_s25 }
 0x250   : > { %s1473_s18 = scalar_lea.vmem %s1882_s25, %s1869_s15  ;;  %s1562_s12 = smov [#allocation12]  }
 0x251   : > { %p1474_p6 = scmp.ne.s32.totalorder %s1882_s25, %s1473_s18  ;;  %s1477_s11 = sshll.u32 %s1562_s12, 4  ;;  %s1478_s11 = int_to_ptr.vmem [resolvable:$false] %s1477_s11 }
 0x252   : > { %s1479_s17 = scalar_lea.vmem %s1478_s11, 1024  ;;  %p1480_p1 = scmp.lt.s32.totalorder %s1882_s25, %s1478_s11 }
 0x253   : > { %p1475_p13 = pnand %p1474_p6, %p1143_p11  ;;  %p1481_p2 = scmp.lt.s32.totalorder %s1479_s17, %s1473_s18 }
 0x255   : > { %p1476_p10 = pneg %p1475_p13  ;;  %p1482_p3 = por %p1481_p2, %p1480_p1 }
 0x257   : > { %p1483_p12 = pnand %p1482_p3, %p1476_p10 }
 0x259   : > { %1486 = shalt.err (!%p1483_p12)
}
 0x25a   : > { %s1487_s21 = scalar_lea.hbm %s1879_s28, %s1869_s15  ;;  %s1491_s26 = scalar_lea.hbm %s1936_s10, 1280 }
 0x25b   : > { %p1488_p4 = scmp.ne.s32.totalorder %s1879_s28, %s1487_s21  ;;  %p1492_p0 = scmp.lt.s32.totalorder %s1879_s28, %s1936_s10 }
 0x25c   : > { %p1493_p9 = scmp.lt.s32.totalorder %s1491_s26, %s1487_s21 }
 0x25d   : > { %p1489_p7 = pnand %p1488_p4, %p1143_p11 }
 0x25e   : > { %p1494_p5 = por %p1493_p9, %p1492_p0 }
 0x25f   : > { %p1490_p8 = pneg %p1489_p7 }
 0x261   : > { %p1495_p6 = pnand %p1494_p5, %p1490_p8 }
 0x263   : > { %1498 = shalt.err (!%p1495_p6)
}
 0x264   : > { %s1563_s0 = smov 256   ;;  %s1564_s23 = smov 16  }
 0x265   : > { %s1964_s27 = scalar_lea.sflag [#allocation13], %s1778_s22 }
 0x266   : > { %965 = dma.vmem_to_hbm [thread:$0]  (%p1143_p11), %s1882_s25, %s1869_s15, %s1879_s28, %s1964_s27, %s1563_s0, %s1563_s0, %s1564_s23  }
 0x267 PF: > { %p1248_p13 = scmp.ge.s32.totalorder %s1549_s16, 2  ;;  %s974_s18 = sand.u32 1, %s1537_s13  }
 0x268   : > { %p1965_p10 = scmp.ne.s32.totalorder %s1948_s24, 0  ;;  %s975_s12 = scalar_lea.sflag [#allocation4], %s974_s18 }
 0x26a   : > { %p1232_p1 = pnand %p1248_p13, %p1965_p10 }
 0x26c   : > { %p1233_p2 = pneg %p1232_p1 }
 0x26e   : > { %1528 = dma.done.wait (%p1233_p2), %s975_s12, 256  }
 0x26f   : > { %1530 = vsyncadd (%p1233_p2), %s975_s12, 4294967040  ;;  %s984_s11 = scalar_lea.sflag [#allocation13], %s974_s18 }
 0x270   : > { %1532 = dma.done.wait (%p1233_p2), %s984_s11, 512  }
 0x271   : > { %1534 = vsyncadd (%p1233_p2), %s984_s11, 4294966784  ;;  %s1966_s16 = sld [smem:[#allocation20_spill]]  ;;  %s1969_s13 = smov %s1541_s14 }
 0x272   : > { %s1967_s22 = sld [smem:[#allocation19_spill]] }
 0x273   : > { %s1968_s15 = sld [smem:[#allocation21_spill]] }
 0x277   : > { %p27_p11 = scmp.ge.s32.totalorder %s1966_s16, 5  }
 0x278   : > { %s1970_s14 = smov %s1967_s22 }
 0x279   :  { %29 = sbr.rel (!%p27_p11) target bundleno = 10 (0xa), region = 129 }
 0x27e   :  { %989 = vsyncpa [#allocation3], 1 }
 0x27f   :  { %991 = vsyncpa [#allocation3 + $0x1], 1 }
 0x280   :  { %992 = vsyncpa [#allocation6], 1 }
 0x281   :  { %993 = vsyncpa [#allocation9], 1 }
 0x282   :  { %994 = vsyncpa [#allocation4], 1 }
 0x283   :  { %996 = vsyncpa [#allocation4 + $0x1], 1 }
 0x284   :  { %997 = vsyncpa [#allocation13], 1 }
 0x285   :  { %999 = vsyncpa [#allocation13 + $0x1], 1 }

</bundles_post_ra>
